<compile_context>
chip_gen: v5e
topology: v5e:2x2
jax: 0.10.0
libtpu: 0.0.40
codegen_flags: <defaults>
</compile_context>

<pallas_src>
import functools
import math
from collections import namedtuple

import jax
import jax.numpy as jnp
from jax.experimental import pallas as pl
from jax.experimental.pallas import tpu as pltpu


# ------------------------------ small helpers ---------------------------------

@functools.lru_cache(maxsize=None)
def _vmem_limit():
    """Per-generation VMEM cap: 96 MiB on v5e/v6e (128 MiB phys), 48 MiB on v7x."""
    try:
        cap = pltpu.get_tpu_info().vmem_capacity_bytes
        return int(min(cap * 3 // 4, 96 * 1024 * 1024))
    except Exception:  # pragma: no cover - conservative fallback
        return 48 * 1024 * 1024


def _pick_tile(dim, candidates):
    """Largest candidate tile that divides `dim`, else the full dim."""
    for c in candidates:
        if dim >= c and dim % c == 0:
            return c
    return dim


def _apply_act(x, act):
    if act == "silu":
        return x * jax.nn.sigmoid(x)
    if act == "sigmoid":
        return jax.nn.sigmoid(x)
    return x


# ----------------------------- Pallas kernels --------------------------------

# --- act(x @ w + b) : stem / expand / head 1x1 convs --------------------------

def _matmul_kernel(x_ref, w_ref, b_ref, o_ref, *, act):
    acc = jnp.dot(x_ref[...], w_ref[...], preferred_element_type=jnp.float32)
    acc = acc + b_ref[...]
    o_ref[...] = _apply_act(acc, act).astype(o_ref.dtype)


@functools.lru_cache(maxsize=None)
def _matmul_call(M, K, N, act):
    TM = _pick_tile(M, (512, 256, 128))
    TN = _pick_tile(N, (512, 384, 256, 128))
    return pl.pallas_call(
        functools.partial(_matmul_kernel, act=act),
        out_shape=jax.ShapeDtypeStruct((M, N), jnp.bfloat16),
        grid=(M // TM, N // TN),
        in_specs=[
            pl.BlockSpec((TM, K), lambda i, j: (i, 0)),
            pl.BlockSpec((K, TN), lambda i, j: (0, j)),
            pl.BlockSpec((1, TN), lambda i, j: (0, j)),
        ],
        out_specs=pl.BlockSpec((TM, TN), lambda i, j: (i, j)),
        compiler_params=pltpu.CompilerParams(
            dimension_semantics=("parallel", "parallel"),
            vmem_limit_bytes=_vmem_limit(),
        ),
    )


def matmul_act(x, w, b, act="linear"):
    """act(x @ w + b) on the MXU. x:[M,K] bf16, w:[K,N] bf16, b:[N] f32."""
    M, K = x.shape
    N = w.shape[1]
    return _matmul_call(M, K, N, act)(x, w, b.reshape(1, N))


# --- depthwise conv + SiLU (stride 1) + fused SE pool --------------------------
# Channel-tiled grid; per output row, the f32 accumulator lives in vregs and is
# stored exactly once.  Second output = per-channel sums of the bf16 result.

def _dwconv_s1_kernel(x_ref, w_ref, b_ref, o_ref, p_ref, *, k, Ho, Wo):
    TC = o_ref.shape[-1]
    bias_b = jnp.broadcast_to(b_ref[0], (Wo, TC))              # hoisted broadcast
    csum = jnp.zeros((1, TC), jnp.float32)
    for r in range(Ho):                                         # static row loop
        acc = bias_b
        for di in range(k):
            for dj in range(k):
                tap = x_ref[0, r + di, dj:dj + Wo, :]           # (Wo, TC) bf16
                acc = acc + tap.astype(jnp.float32) * w_ref[di * k + dj]
        y = acc * jax.nn.sigmoid(acc)                           # SiLU, f32
        y_bf = y.astype(o_ref.dtype)
        o_ref[0, r] = y_bf
        csum = csum + jnp.sum(y_bf.astype(jnp.float32), axis=0, keepdims=True)
    p_ref[0] = csum


@functools.lru_cache(maxsize=None)
def _dwconv_s1_call(N, Hp, Wp, C, k):
    Ho, Wo = Hp - (k - 1), Wp - (k - 1)
    TC = _pick_tile(C, (256, 128))
    return pl.pallas_call(
        functools.partial(_dwconv_s1_kernel, k=k, Ho=Ho, Wo=Wo),
        out_shape=(jax.ShapeDtypeStruct((N, Ho, Wo, C), jnp.bfloat16),
                   jax.ShapeDtypeStruct((N, 1, C), jnp.float32)),
        grid=(N, C // TC),
        in_specs=[
            pl.BlockSpec((1, Hp, Wp, TC), lambda n, c: (n, 0, 0, c)),
            pl.BlockSpec((k * k, TC), lambda n, c: (0, c)),
            pl.BlockSpec((1, TC), lambda n, c: (0, c)),
        ],
        out_specs=(pl.BlockSpec((1, Ho, Wo, TC), lambda n, c: (n, 0, 0, c)),
                   pl.BlockSpec((1, 1, TC), lambda n, c: (n, 0, c))),
        compiler_params=pltpu.CompilerParams(
            dimension_semantics=("parallel", "parallel"),
            vmem_limit_bytes=_vmem_limit(),
        ),
    )


# --- depthwise conv + SiLU (stride 2) via row/col parity phases ----------------
# The padded input is split (in XLA, 1x traffic) into 4 phase arrays indexed by
# (row parity, col parity); every tap then becomes a contiguous stride-1 read.

def _dwconv_s2_kernel(x00_ref, x01_ref, x10_ref, x11_ref, w_ref, b_ref,
                      o_ref, p_ref, *, k, Ho, Wo):
    TC = o_ref.shape[-1]
    phases = ((x00_ref, x01_ref), (x10_ref, x11_ref))
    bias_b = jnp.broadcast_to(b_ref[0], (Wo, TC))
    csum = jnp.zeros((1, TC), jnp.float32)
    for r in range(Ho):
        acc = bias_b
        for di in range(k):
            for dj in range(k):
                ph = phases[di % 2][dj % 2]
                tap = ph[0, r + di // 2, dj // 2:dj // 2 + Wo, :]   # (Wo, TC)
                acc = acc + tap.astype(jnp.float32) * w_ref[di * k + dj]
        y = acc * jax.nn.sigmoid(acc)
        y_bf = y.astype(o_ref.dtype)
        o_ref[0, r] = y_bf
        csum = csum + jnp.sum(y_bf.astype(jnp.float32), axis=0, keepdims=True)
    p_ref[0] = csum


@functools.lru_cache(maxsize=None)
def _dwconv_s2_call(N, Ph, Pw, C, k, Ho, Wo):
    TC = _pick_tile(C, (256, 128))
    phase_spec = pl.BlockSpec((1, Ph, Pw, TC), lambda n, c: (n, 0, 0, c))
    return pl.pallas_call(
        functools.partial(_dwconv_s2_kernel, k=k, Ho=Ho, Wo=Wo),
        out_shape=(jax.ShapeDtypeStruct((N, Ho, Wo, C), jnp.bfloat16),
                   jax.ShapeDtypeStruct((N, 1, C), jnp.float32)),
        grid=(N, C // TC),
        in_specs=[phase_spec, phase_spec, phase_spec, phase_spec,
                  pl.BlockSpec((k * k, TC), lambda n, c: (0, c)),
                  pl.BlockSpec((1, TC), lambda n, c: (0, c))],
        out_specs=(pl.BlockSpec((1, Ho, Wo, TC), lambda n, c: (n, 0, 0, c)),
                   pl.BlockSpec((1, 1, TC), lambda n, c: (n, 0, c))),
        compiler_params=pltpu.CompilerParams(
            dimension_semantics=("parallel", "parallel"),
            vmem_limit_bytes=_vmem_limit(),
        ),
    )


# --- Squeeze-Excite on the fused pooled sums: fc1(SiLU) + fc2(sigmoid) ---------

def _se_kernel(p_ref, w1_ref, b1_ref, w2_ref, b2_ref, o_ref, *, inv_hw):
    pooled = p_ref[...][:, 0, :] * inv_hw                               # [N, C]
    h = jnp.dot(pooled.astype(jnp.bfloat16), w1_ref[...],
                preferred_element_type=jnp.float32) + b1_ref[...]
    h = h * jax.nn.sigmoid(h)                                           # SiLU
    s = jnp.dot(h.astype(jnp.bfloat16), w2_ref[...],
                preferred_element_type=jnp.float32) + b2_ref[...]
    o_ref[...] = jax.nn.sigmoid(s)


@functools.lru_cache(maxsize=None)
def _se_call(N, C, SQ, HW):
    return pl.pallas_call(
        functools.partial(_se_kernel, inv_hw=1.0 / HW),
        out_shape=jax.ShapeDtypeStruct((N, C), jnp.float32),
        grid=(1,),
        in_specs=[
            pl.BlockSpec((N, 1, C), lambda i: (0, 0, 0)),
            pl.BlockSpec((C, SQ), lambda i: (0, 0)),
            pl.BlockSpec((1, SQ), lambda i: (0, 0)),
            pl.BlockSpec((SQ, C), lambda i: (0, 0)),
            pl.BlockSpec((1, C), lambda i: (0, 0)),
        ],
        out_specs=pl.BlockSpec((N, C), lambda i: (0, 0)),
        compiler_params=pltpu.CompilerParams(vmem_limit_bytes=_vmem_limit()),
    )


# --- fused SE-scale + 1x1 projection conv (+ residual add) --------------------

def _scale_proj_kernel(x_ref, s_ref, w_ref, b_ref, *rest, residual):
    if residual:
        r_ref, o_ref = rest
    else:
        (o_ref,) = rest
    xs = (x_ref[0] * s_ref[0]).astype(jnp.bfloat16)                # [THW, Cin]
    acc = jnp.dot(xs, w_ref[...], preferred_element_type=jnp.float32)
    acc = acc + b_ref[...]
    if residual:                       # stochastic depth == identity in eval
        acc = acc + r_ref[0].astype(jnp.float32)
    o_ref[0] = acc.astype(o_ref.dtype)


@functools.lru_cache(maxsize=None)
def _scale_proj_call(N, HW, Cin, Cout, residual):
    THW = _pick_tile(HW, (512, 256))
    in_specs = [
        pl.BlockSpec((1, THW, Cin), lambda n, i: (n, i, 0)),
        pl.BlockSpec((1, 1, Cin), lambda n, i: (n, 0, 0)),
        pl.BlockSpec((Cin, Cout), lambda n, i: (0, 0)),
        pl.BlockSpec((1, Cout), lambda n, i: (0, 0)),
    ]
    if residual:
        in_specs.append(pl.BlockSpec((1, THW, Cout), lambda n, i: (n, i, 0)))
    return pl.pallas_call(
        functools.partial(_scale_proj_kernel, residual=residual),
        out_shape=jax.ShapeDtypeStruct((N, HW, Cout), jnp.bfloat16),
        grid=(N, HW // THW),
        in_specs=in_specs,
        out_specs=pl.BlockSpec((1, THW, Cout), lambda n, i: (n, i, 0)),
        compiler_params=pltpu.CompilerParams(
            dimension_semantics=("parallel", "parallel"),
            vmem_limit_bytes=_vmem_limit(),
        ),
    )


# --- fused global avgpool + classifier (HW-tiled accumulation) -----------------

def _pool_cls_kernel(x_ref, w_ref, b_ref, o_ref, acc_ref, *, inv_hw):
    @pl.when(pl.program_id(0) == 0)
    def _():
        acc_ref[...] = jnp.zeros_like(acc_ref)

    acc_ref[...] = acc_ref[...] + jnp.sum(
        x_ref[...].astype(jnp.float32), axis=1)

    @pl.when(pl.program_id(0) == pl.num_programs(0) - 1)
    def _():
        pooled = (acc_ref[...] * inv_hw).astype(jnp.bfloat16)
        o_ref[...] = (jnp.dot(pooled, w_ref[...],
                              preferred_element_type=jnp.float32) + b_ref[...])


@functools.lru_cache(maxsize=None)
def _pool_cls_call(N, HW, C, NP):
    THW = _pick_tile(HW, (512, 256))
    return pl.pallas_call(
        functools.partial(_pool_cls_kernel, inv_hw=1.0 / HW),
        out_shape=jax.ShapeDtypeStruct((N, NP), jnp.float32),
        grid=(HW // THW,),
        in_specs=[
            pl.BlockSpec((N, THW, C), lambda i: (0, i, 0)),
            pl.BlockSpec((C, NP), lambda i: (0, 0)),
            pl.BlockSpec((1, NP), lambda i: (0, 0)),
        ],
        out_specs=pl.BlockSpec((N, NP), lambda i: (0, 0)),
        scratch_shapes=[pltpu.VMEM((N, C), jnp.float32)],
        compiler_params=pltpu.CompilerParams(
            dimension_semantics=("arbitrary",),
            vmem_limit_bytes=_vmem_limit(),
        ),
    )


# ----------------------- layers (JAX glue + Pallas) ---------------------------

def conv1x1(x, w, b, act):
    N, H, W, C = x.shape
    y = matmul_act(x.reshape(N * H * W, C), w, b, act)
    return y.reshape(N, H, W, w.shape[1])


def depthwise_conv_silu(x, w, b, k, stride):
    """Returns (silu(dwconv(x)+b), per-channel spatial sums [N,1,C])."""
    N, H, W, C = x.shape
    pad = (k - 1) // 2
    if stride == 1:
        xp = jnp.pad(x, ((0, 0), (pad, pad), (pad, pad), (0, 0)))
        return _dwconv_s1_call(N, H + 2 * pad, W + 2 * pad, C, k)(
            xp, w, b.reshape(1, C))
    # stride 2: split the padded image into 4 (row,col)-parity phases in XLA.
    Ho = (H + 2 * pad - k) // 2 + 1
    Wo = (W + 2 * pad - k) // 2 + 1
    Ph, Pw = Ho + pad, Wo + pad
    Hp, Wp = H + 2 * pad, W + 2 * pad
    eh = max(0, 2 * Ph - Hp)
    ew = max(0, 2 * Pw - Wp)
    xp = jnp.pad(x, ((0, 0), (pad, pad + eh), (pad, pad + ew), (0, 0)))
    phases = [xp[:, a::2, c::2, :][:, :Ph, :Pw, :]
              for a in (0, 1) for c in (0, 1)]
    return _dwconv_s2_call(N, Ph, Pw, C, k, Ho, Wo)(
        *phases, w, b.reshape(1, C))


def _extract_patches(x, k, stride):
    """x:[N,H,W,C] -> ([N*Ho*Wo, k*k*C], Ho, Wo). Used only for the tiny stem."""
    N, H, W, C = x.shape
    p = (k - 1) // 2
    Ho = (H + 2 * p - k) // stride + 1
    Wo = (W + 2 * p - k) // stride + 1
    xp = jnp.pad(x, ((0, 0), (p, p), (p, p), (0, 0)))
    cols = []
    for di in range(k):
        for dj in range(k):
            v = jax.lax.slice(
                xp,
                (0, di, dj, 0),
                (N, di + (Ho - 1) * stride + 1, dj + (Wo - 1) * stride + 1, C),
                (1, stride, stride, 1),
            )
            cols.append(v.reshape(N * Ho * Wo, C))
    return jnp.concatenate(cols, axis=1), Ho, Wo


@jax.jit
def stem_block(x, w, b):
    N, H, W, C = x.shape
    patches, Ho, Wo = _extract_patches(x, 3, 2)
    y = matmul_act(patches, w, b, "silu")
    return y.reshape(N, Ho, Wo, w.shape[1])


@functools.partial(jax.jit, static_argnames=("k", "stride", "use_res"))
def mbconv_block(x, p, *, k, stride, use_res):
    inp = x
    if "expand_w" in p:
        x = conv1x1(x, p["expand_w"], p["expand_b"], "silu")
    x, psum = depthwise_conv_silu(x, p["dw_w"], p["dw_b"], k, stride)

    N, H, W, C = x.shape
    HW = H * W
    x3 = x.reshape(N, HW, C)
    sq = p["se1_w"].shape[1]
    s = _se_call(N, C, sq, HW)(
        psum, p["se1_w"], p["se1_b"].reshape(1, sq),
        p["se2_w"], p["se2_b"].reshape(1, C))

    cout = p["proj_w"].shape[1]
    if use_res:
        y3 = _scale_proj_call(N, HW, C, cout, True)(
            x3, s.reshape(N, 1, C), p["proj_w"], p["proj_b"].reshape(1, cout),
            inp.reshape(N, HW, cout))
    else:
        y3 = _scale_proj_call(N, HW, C, cout, False)(
            x3, s.reshape(N, 1, C), p["proj_w"], p["proj_b"].reshape(1, cout))
    return y3.reshape(N, H, W, cout)


@jax.jit
def head_block(x, w, b):
    return conv1x1(x, w, b, "silu")


@functools.partial(jax.jit, static_argnames=("num_classes",))
def pool_classify(x, w, b, *, num_classes):
    N, H, W, C = x.shape
    NP = w.shape[1]
    logits = _pool_cls_call(N, H * W, C, NP)(
        x.reshape(N, H * W, C), w, b.reshape(1, NP))
    # classifier = Dropout(0.5) [identity in eval] -> Linear(2560, num_classes)
    return logits[:, :num_classes]


# --------------------- EfficientNet-B7 configuration -------------------------

# (expand_ratio, kernel, stride, in_ch, out_ch, num_layers) -- B0 base setting
_B0_SETTING = [
    (1, 3, 1, 32, 16, 1),
    (6, 3, 2, 16, 24, 2),
    (6, 5, 2, 24, 40, 2),
    (6, 3, 2, 40, 80, 3),
    (6, 5, 1, 80, 112, 3),
    (6, 5, 2, 112, 192, 4),
    (6, 3, 1, 192, 320, 1),
]
_WIDTH_MULT, _DEPTH_MULT = 2.0, 3.1      # efficientnet_b7
_BN_EPS = 1e-3

BlockCfg = namedtuple("BlockCfg", ["k", "stride", "use_res", "in_c", "out_c", "exp_c", "sq_c"])


def _make_divisible(v, divisor=8):
    new_v = max(divisor, int(v + divisor / 2) // divisor * divisor)
    if new_v < 0.9 * v:
        new_v += divisor
    return new_v


def _adjust_channels(c):
    return _make_divisible(c * _WIDTH_MULT)


def _adjust_depth(n):
    return int(math.ceil(n * _DEPTH_MULT))


def efficientnet_b7_block_cfgs():
    cfgs = []
    for (e, k, s, cin, cout, layers) in _B0_SETTING:
        in_c = _adjust_channels(cin)
        out_c = _adjust_channels(cout)
        for li in range(_adjust_depth(layers)):
            block_in = in_c if li == 0 else out_c
            stride = s if li == 0 else 1
            exp_c = _make_divisible(block_in * e)
            sq_c = max(1, block_in // 4)
            use_res = (stride == 1) and (block_in == out_c)
            cfgs.append(BlockCfg(k, stride, use_res, block_in, out_c, exp_c, sq_c))
    return cfgs


class _Init:
    def __init__(self, seed):
        self._key = jax.random.PRNGKey(seed)
        self._n = 0

    def normal(self, shape, scale):
        self._n += 1
        k = jax.random.fold_in(self._key, self._n)
        return scale * jax.random.normal(k, shape, jnp.float32)


def _conv_bn(init, fan_in_rows, cout):
    """Bias-free conv weight (rows = receptive-field*cin) + eval BN, folded."""
    w = init.normal((fan_in_rows, cout), 1.0 / math.sqrt(fan_in_rows))
    gamma = 1.0 + init.normal((cout,), 0.1)
    beta = init.normal((cout,), 0.05)
    mean = init.normal((cout,), 0.05)
    var = 1.0 + jnp.abs(init.normal((cout,), 0.1))
    scale = gamma / jnp.sqrt(var + _BN_EPS)
    return w * scale[None, :], beta - mean * scale


def build_params(seed, num_classes):
    bf16 = jnp.bfloat16
    init = _Init(seed)
    cfgs = efficientnet_b7_block_cfgs()
    stem_c = _adjust_channels(32)               # 64
    last_in = cfgs[-1].out_c                    # 640
    last_out = 4 * last_in                      # 2560

    sw, sb = _conv_bn(init, 3 * 3 * 3, stem_c)
    stem = (sw.astype(bf16), sb)
    blocks = []
    for cfg in cfgs:
        p = {}
        if cfg.exp_c != cfg.in_c:
            ew, eb = _conv_bn(init, cfg.in_c, cfg.exp_c)
            p["expand_w"], p["expand_b"] = ew.astype(bf16), eb
        dw, db = _conv_bn(init, cfg.k * cfg.k, cfg.exp_c)
        p["dw_w"], p["dw_b"] = dw, db            # depthwise weights stay f32 (VPU)
        p["se1_w"] = init.normal((cfg.exp_c, cfg.sq_c),
                                 1.0 / math.sqrt(cfg.exp_c)).astype(bf16)
        p["se1_b"] = init.normal((cfg.sq_c,), 0.05)
        p["se2_w"] = init.normal((cfg.sq_c, cfg.exp_c),
                                 1.0 / math.sqrt(cfg.sq_c)).astype(bf16)
        p["se2_b"] = init.normal((cfg.exp_c,), 0.05)
        pw, pb = _conv_bn(init, cfg.exp_c, cfg.out_c)
        p["proj_w"], p["proj_b"] = pw.astype(bf16), pb
        blocks.append(p)
    hw_, hb_ = _conv_bn(init, last_in, last_out)
    head = (hw_.astype(bf16), hb_)

    # classifier: zero-pad output lanes to a multiple of 128 (exact), slice later
    ncp = ((num_classes + 127) // 128) * 128
    cw = init.normal((last_out, num_classes), 1.0 / math.sqrt(last_out))
    cb = init.normal((num_classes,), 0.05)
    cls_w = jnp.zeros((last_out, ncp), jnp.float32).at[:, :num_classes].set(cw).astype(bf16)
    cls_b = jnp.zeros((ncp,), jnp.float32).at[:num_classes].set(cb)
    return dict(stem=stem, blocks=blocks, head=head, cls=(cls_w, cls_b)), cfgs


def efficientnet_b7_pallas(params, cfgs, x_nchw, num_classes):
    # layout: NCHW (PyTorch) -> NHWC internally (channels on the lane axis).
    x = jnp.transpose(x_nchw, (0, 2, 3, 1)).astype(jnp.bfloat16)
    x = stem_block(x, *params["stem"])
    for cfg, p in zip(cfgs, params["blocks"]):
        x = mbconv_block(x, p, k=cfg.k, stride=cfg.stride, use_res=cfg.use_res)
    x = head_block(x, *params["head"])
    return pool_classify(x, *params["cls"], num_classes=num_classes)


# -------------------------- pure-JAX reference --------------------------------
# Same math in f32/HIGHEST with the SAME bf16 storage-quantization points as the
# Pallas path, so the comparison isolates kernel correctness.

_HI = jax.lax.Precision.HIGHEST


def _f32(t):
    return t.astype(jnp.float32)


def _q(t):  # bf16 storage round-trip
    return t.astype(jnp.bfloat16).astype(jnp.float32)


def _ref_conv(x, w_flat, b, k, stride, cin):
    w = w_flat.reshape(k, k, cin, w_flat.shape[1])
    p = (k - 1) // 2
    y = jax.lax.conv_general_dilated(
        x, w, (stride, stride), ((p, p), (p, p)),
        dimension_numbers=("NHWC", "HWIO", "NHWC"), precision=_HI)
    return y + b


def _ref_dwconv(x, w_flat, b, k, stride):
    c = x.shape[-1]
    w = w_flat.reshape(k, k, 1, c)
    p = (k - 1) // 2
    y = jax.lax.conv_general_dilated(
        x, w, (stride, stride), ((p, p), (p, p)),
        dimension_numbers=("NHWC", "HWIO", "NHWC"),
        feature_group_count=c, precision=_HI)
    return y + b


def efficientnet_b7_reference(params, cfgs, x_nchw, num_classes):
    x = _q(jnp.transpose(x_nchw, (0, 2, 3, 1)).astype(jnp.float32))
    x = _q(jax.nn.silu(_ref_conv(x, _f32(params["stem"][0]), params["stem"][1],
                                 3, 2, 3)))
    for cfg, p in zip(cfgs, params["blocks"]):
        inp = x
        if "expand_w" in p:
            x = _q(jax.nn.silu(jnp.dot(x, _f32(p["expand_w"]), precision=_HI)
                               + p["expand_b"]))
        x = _q(jax.nn.silu(_ref_dwconv(x, p["dw_w"], p["dw_b"], cfg.k, cfg.stride)))
        pooled = jnp.mean(x, axis=(1, 2))
        h = jax.nn.silu(jnp.dot(_q(pooled), _f32(p["se1_w"]), precision=_HI)
                        + p["se1_b"])
        s = jax.nn.sigmoid(jnp.dot(_q(h), _f32(p["se2_w"]), precision=_HI)
                           + p["se2_b"])
        xs = _q(x * s[:, None, None, :])
        y = jnp.dot(xs, _f32(p["proj_w"]), precision=_HI) + p["proj_b"]
        if cfg.use_res:
            y = y + inp
        x = _q(y)
    x = _q(jax.nn.silu(jnp.dot(x, _f32(params["head"][0]), precision=_HI)
                       + params["head"][1]))
    pooled = jnp.mean(x, axis=(1, 2))
    logits = jnp.dot(_q(pooled), _f32(params["cls"][0]), precision=_HI) + params["cls"][1]
    return logits[:, :num_classes]


# ------------------------------------ main ------------------------------------

if __name__ == "__main__":
    num_classes = 6
    params, cfgs = build_params(seed=0, num_classes=num_classes)

    key = jax.random.PRNGKey(0)
    x = jax.random.normal(key, (2, 3, 64, 64), jnp.float32)   # NCHW, like PyTorch

    out = jax.block_until_ready(efficientnet_b7_pallas(params, cfgs, x, num_classes))
    assert out.shape == (2, num_classes), out.shape
    assert bool(jnp.all(jnp.isfinite(out))), "non-finite output"

    ref = jax.block_until_ready(efficientnet_b7_reference(params, cfgs, x, num_classes))
    rel = float(jnp.max(jnp.abs(out - ref)) / (jnp.max(jnp.abs(ref)) + 1e-12))
    assert rel < 3e-2, f"Pallas/XLA mismatch, normalized max err = {rel}"

    print("KERNEL_OK")
</pallas_src>

<mosaic_0001>
module attributes {stable_mosaic.version = 11 : i64} {
  func.func @_matmul_kernel(%arg0: i32, %arg1: i32, %arg2: memref<512x27xbf16, #tpu.memory_space<vmem>>, %arg3: memref<27x64xbf16, #tpu.memory_space<vmem>>, %arg4: memref<1x64xf32, #tpu.memory_space<vmem>>, %arg5: memref<512x64xbf16, #tpu.memory_space<vmem>>) attributes {dimension_semantics = [#tpu.dimension_semantics<parallel>, #tpu.dimension_semantics<parallel>], iteration_bounds = array<i64: 4, 1>, scalar_prefetch = 0 : i64, scratch_operands = 0 : i64, tpu.core_type = #tpu.core_type<tc>, window_params = [{transform_indices = @transform_0, window_bounds = array<i64: 512, 27>}, {transform_indices = @transform_1, window_bounds = array<i64: 27, 64>}, {transform_indices = @transform_2, window_bounds = array<i64: 1, 64>}, {transform_indices = @transform_3, window_bounds = array<i64: 512, 64>}]} {
    %c0 = arith.constant 0 : index
    %c0_0 = arith.constant 0 : index
    %0 = vector.load %arg2[%c0, %c0_0] : memref<512x27xbf16, #tpu.memory_space<vmem>>, vector<512x27xbf16>
    %c0_1 = arith.constant 0 : index
    %c0_2 = arith.constant 0 : index
    %1 = vector.load %arg3[%c0_1, %c0_2] : memref<27x64xbf16, #tpu.memory_space<vmem>>, vector<27x64xbf16>
    %cst = arith.constant dense<0.000000e+00> : vector<512x64xf32>
    %2 = tpu.matmul %0, %1, %cst {dimension_numbers = #tpu.dot_dimension_numbers<[1], [0], [0], [1], [0, 0, 1, 1], [], []>} : vector<512x27xbf16>, vector<27x64xbf16>, vector<512x64xf32> -> vector<512x64xf32>
    %c0_3 = arith.constant 0 : index
    %c0_4 = arith.constant 0 : index
    %3 = vector.load %arg4[%c0_3, %c0_4] : memref<1x64xf32, #tpu.memory_space<vmem>>, vector<1x64xf32>
    %4 = vector.broadcast %3 : vector<1x64xf32> to vector<512x64xf32>
    %5 = arith.addf %2, %4 : vector<512x64xf32>
    %6 = arith.negf %5 : vector<512x64xf32>
    %7 = math.exp %6 : vector<512x64xf32>
    %cst_5 = arith.constant 1.000000e+00 : f32
    %8 = vector.broadcast %cst_5 : f32 to vector<512x64xf32>
    %9 = arith.addf %8, %7 : vector<512x64xf32>
    %10 = arith.divf %8, %9 : vector<512x64xf32>
    %11 = arith.mulf %5, %10 : vector<512x64xf32>
    %12 = arith.truncf %11 : vector<512x64xf32> to vector<512x64xbf16>
    %c0_6 = arith.constant 0 : index
    %c0_7 = arith.constant 0 : index
    %13 = vector.load %arg5[%c0_6, %c0_7] : memref<512x64xbf16, #tpu.memory_space<vmem>>, vector<512x64xbf16>
    tpu.vector_store %arg5[%c0_6, %c0_7], %12 {strides = array<i32>} : memref<512x64xbf16, #tpu.memory_space<vmem>>, vector<512x64xbf16>,
    return
  }
  func.func @transform_0(%arg0: i32, %arg1: i32) -> (i32, i32) {
    %c0_i32 = arith.constant 0 : i32
    %c0_i32_0 = arith.constant 0 : i32
    return %arg0, %c0_i32 : i32, i32
  }
  func.func @transform_1(%arg0: i32, %arg1: i32) -> (i32, i32) {
    %c0_i32 = arith.constant 0 : i32
    %c0_i32_0 = arith.constant 0 : i32
    return %c0_i32, %arg1 : i32, i32
  }
  func.func @transform_2(%arg0: i32, %arg1: i32) -> (i32, i32) {
    %c0_i32 = arith.constant 0 : i32
    %c0_i32_0 = arith.constant 0 : i32
    return %c0_i32, %arg1 : i32, i32
  }
  func.func @transform_3(%arg0: i32, %arg1: i32) -> (i32, i32) {
    %c0_i32 = arith.constant 0 : i32
    return %arg0, %arg1 : i32, i32
  }
}

</mosaic_0001>

<bundles_post_ra>
// kernel: stem_block.1
= control target key start
LH: loop header
LB: loop body
LE: loop exit
PB: predicated region body
PF: predicated region fallthrough
CT: control target
= control target key end

     0   :  { %8 = vsyncpa [#allocation3], 0  ;;  %s4502_s0 = inlined_call_operand.vmem [shape: bf16[2048,27], index: 0, kind: input, shape index: {}]   ;;  %s4503_s1 = inlined_call_operand.vmem [shape: bf16[27,64], index: 1, kind: input, shape index: {}]   ;;  %s4504_s2 = inlined_call_operand.vmem [shape: f32[1,64], index: 2, kind: input, shape index: {}]   ;;  %s4505_s3 = inlined_call_operand.hbm [shape: bf16[2048,64], index: 3, kind: output, shape index: {}]  }
   0x1   :  { %10 = vsyncpa [#allocation3 + $0x1], 0  ;;  %s2967_s12 = smov 0   ;;  %s2969_s13 = smov 0  }
   0x2   :  { %s2971_s14 = smov 0   ;;  %s2973_s15 = smov 0  }
   0x3   :  { %s2975_s16 = smov 0   ;;  %s2977_s17 = smov 0  }
   0x4 LB: > { %s2259_s18 = sadd.s32 4294967295, %s2942_s17   ;;  %s2260_s19 = sadd.s32 4294967294, %s2942_s17   ;;  %s2942_s17 = sphi %s2977_s17, %s16_s17   ;;  %s2938_s16 = sphi %s2975_s16, %s4610_s16   ;;  %s2934_s15 = sphi %s2973_s15, %s4609_s15   ;;  %s2930_s14 = sphi %s2971_s14, %s4608_s14   ;;  %s2926_s13 = sphi %s2969_s13, %s4607_s13   ;;  %s2922_s12 = sphi %s2967_s12, %s4606_s12  }
   0x5   : > { %s28_s20 = sadd.s32 1, %s2938_s16  ;;  %s115_s21 = sadd.s32 1, %s2930_s14 }
   0x6   : > { %p30_p0 = scmp.ge.s32.totalorder %s28_s20, 4  ;;  %p125_p1 = scmp.ne.s32.totalorder %s2930_s14, %s2926_s13 }
   0x7   : > { %p126_p2 = scmp.eq.s32.totalorder %s2259_s18, 3  ;;  %p131_p3 = scmp.ne.s32.totalorder %s2926_s13, %s2922_s12 }
   0x8   : > { %s4612_s20 = smov (%p30_p0, %s28_s20), 0  ;;  %p132_p5 = scmp.eq.s32.totalorder %s2260_s19, 3 }
   0x9   : > { %p3007_p4 = por %p126_p2, %p125_p1  ;;  %s110_s23 = ssub.s32 %s2938_s16, %s4612_s20 }
   0xa   : > { %p2265_p6 = scmp.ge.s32.totalorder %s2942_s17, 1  ;;  %p113_p7 = scmp.eq.s32.totalorder %s110_s23, 0 }
   0xb   : > { %p3014_p8 = por %p132_p5, %p131_p3  ;;  %p172_p9 = scmp.lt.s32.totalorder %s2942_s17, 5 }
   0xc   : > { %s3020_s25 = scalar_select %p113_p7, %s2930_s14, %s115_s21  }
   0xd   : > { %p173_p10 = pnand %p2265_p6, %p172_p9 }
   0xe   : > { %s2267_s30 = sshll.u32 (!%p173_p10), %s2934_s15, 6  ;;  %s200_s18 = sand.u32 (!%p173_p10), 1, %s2926_s13  }
   0xf   : > { %176 = sbr.rel (%p173_p10) target bundleno = 491 (0x1eb), region = 32  ;;  %p204_p11 = scmp.lt.s32.totalorder (!%p173_p10), %s2267_s30, 255 }
  0x10   : > { %s3200_s19 = sshll.u32 (!%p173_p10), %s200_s18, 8  ;;  %s2540_s29 = sshll.u32 (!%p173_p10), %s2934_s15, 8 }
  0x11   : > { %s3231_s21 = scalar_lea.vmem (!%p173_p10), [#allocation2], %s3200_s19  ;;  %s2156_s5 = scalar_lea.hbm (!%p173_p10), %s4505_s3, %s2540_s29 }
  0x12   : > { %s2157_s15 = sshll.u32 (!%p173_p10), %s3231_s21, 4  ;;  %s2144_s7 = scalar_lea.sflag (!%p173_p10), [#allocation3], %s200_s18  ;;  %s2158_s15 = int_to_ptr.vmem [resolvable:$true] %s2157_s15 }
  0x13   : > { %s2884_s19 = scalar_lea.hbm (!%p173_p10), %s4505_s3, 1024 }
  0x14   : > { %v2403_v0 = vld [vmem:[%s4503_s1 + $0x8] sm:$0xf]  ;;  %v2539_v1 = vld [vmem:[%s4503_s1 + $0x8] sm:$0x30]  ;;  %vm558_vm0 = vcmask 1044480   ;;  %vm559_vm1 = vcmask 1045504  }
  0x15   : > { %v2404_v2 = vor.u32 %v2539_v1, %v2403_v0  ;;  %v2944_v3 = vmov 65535   ;;  %s4614_s30 = smov (!%p204_p11, %s2267_s30), 255  ;;  %v2538_v7 = vld [vmem:[%s4503_s1] sm:$0xff]  ;;  %vm461_vm2 = vcmask 220160   ;;  %vm2078_vm8 = vcmask 519168  }
  0x16   : > { %v560_v4 = vsel %vm558_vm0, 4294967295, %v2944_v3  ;;  %s2268_s6 = sshll.u32 %s4614_s30, 2  ;;  %v3104_v40 = vld [vmem:[%s4504_s2] ss:$0 sm:$0xff] }
  0x17   : > { %v561_v5 = vsel %vm559_vm1, %v560_v4, 0  ;;  %s3035_s9 = scalar_lea.vmem %s4502_s0, %s2268_s6  ;;  %s2159_s6 = sshll.u32 %s2156_s5, 4  ;;  %s2160_s6 = int_to_ptr.hbm [resolvable:$true] %s2159_s6 }
  0x18   : > { %v563_v6 = vand.u32 %v2404_v2, %v561_v5  ;;  %v2506_v8 = vld [vmem:[%s3035_s9] sm:$0xff]  ;;  %v2507_v12 = vld [vmem:[%s3035_s9 + $0x8] sm:$0xff]  ;;  %v2508_v16 = vld [vmem:[%s3035_s9 + $0x10] sm:$0xff]  ;;  %s2878_s8 = sshra.s32 %s2160_s6, 4  ;;  %s2879_s8 = int_to_ptr.hbm [resolvable:$true] %s2878_s8 }
  0x19   : > { %v2514_v9 = vld [vmem:[%s3035_s9 + $0x40] sm:$0xff]  ;;  %v2515_v13 = vld [vmem:[%s3035_s9 + $0x48] sm:$0xff]  ;;  %v2516_v17 = vld [vmem:[%s3035_s9 + $0x50] sm:$0xff]  ;;  %p2885_p1 = scmp.lt.s32.totalorder %s2879_s8, %s4505_s3 }
  0x1a   : > { %571 = vmatpush.bf16.msra.mxu0 %v563_v6  ;;  %2541 = vmatpush.bf16.msra.mxu1 %v563_v6  ;;  %v2522_v10 = vld [vmem:[%s3035_s9 + $0x80] sm:$0xff]  ;;  %v2523_v14 = vld [vmem:[%s3035_s9 + $0x88] sm:$0xff]  ;;  %v2524_v18 = vld [vmem:[%s3035_s9 + $0x90] sm:$0xff] }
  0x1b   : > { %2542 = vmatpush.bf16.msra.mxu2 %v563_v6  ;;  %2543 = vmatpush.bf16.msra.mxu3 %v563_v6  ;;  %v2530_v11 = vld [vmem:[%s3035_s9 + $0xc0] sm:$0xff]  ;;  %v2531_v15 = vld [vmem:[%s3035_s9 + $0xc8] sm:$0xff]  ;;  %v2532_v19 = vld [vmem:[%s3035_s9 + $0xd0] sm:$0xff] }
  0x1c   : > { %v2509_v20 = vld [vmem:[%s3035_s9 + $0x18] sm:$0xff]  ;;  %v2510_v24 = vld [vmem:[%s3035_s9 + $0x20] sm:$0xff]  ;;  %v2511_v28 = vld [vmem:[%s3035_s9 + $0x28] sm:$0xff] }
  0x1d   : > { %v2517_v21 = vld [vmem:[%s3035_s9 + $0x58] sm:$0xff]  ;;  %v2518_v25 = vld [vmem:[%s3035_s9 + $0x60] sm:$0xff]  ;;  %v2519_v29 = vld [vmem:[%s3035_s9 + $0x68] sm:$0xff] }
  0x1e   : > { %572 = vmatpush.bf16.msra.mxu0 %v2538_v7  ;;  %2544 = vmatpush.bf16.msra.mxu1 %v2538_v7  ;;  %v2525_v22 = vld [vmem:[%s3035_s9 + $0x98] sm:$0xff]  ;;  %v2526_v26 = vld [vmem:[%s3035_s9 + $0xa0] sm:$0xff]  ;;  %v2527_v30 = vld [vmem:[%s3035_s9 + $0xa8] sm:$0xff] }
  0x1f   : > { %2545 = vmatpush.bf16.msra.mxu2 %v2538_v7  ;;  %2546 = vmatpush.bf16.msra.mxu3 %v2538_v7  ;;  %v2533_v23 = vld [vmem:[%s3035_s9 + $0xd8] sm:$0xff]  ;;  %v2534_v27 = vld [vmem:[%s3035_s9 + $0xe0] sm:$0xff]  ;;  %v2535_v31 = vld [vmem:[%s3035_s9 + $0xe8] sm:$0xff] }
  0x20   : > { %v2512_v32 = vld [vmem:[%s3035_s9 + $0x30] sm:$0xff]  ;;  %v2513_v36 = vld [vmem:[%s3035_s9 + $0x38] sm:$0xff] }
  0x21   : > { %2405 = vmatmul.msk.bf16.vlgmr.msra.gmra.mxu0 %vm461_vm2, %v2506_v8  ;;  %2413 = vmatmul.msk.bf16.vlgmr.msra.gmra.mxu1 %vm461_vm2, %v2514_v9  ;;  %v2520_v33 = vld [vmem:[%s3035_s9 + $0x70] sm:$0xff]  ;;  %v2521_v37 = vld [vmem:[%s3035_s9 + $0x78] sm:$0xff] }
  0x22   : > { %2421 = vmatmul.msk.bf16.vlgmr.msra.gmra.mxu2 %vm461_vm2, %v2522_v10  ;;  %2429 = vmatmul.msk.bf16.vlgmr.msra.gmra.mxu3 %vm461_vm2, %v2530_v11  ;;  %v2528_v34 = vld [vmem:[%s3035_s9 + $0xb0] sm:$0xff]  ;;  %v2529_v38 = vld [vmem:[%s3035_s9 + $0xb8] sm:$0xff] }
  0x23   : > { %v2536_v35 = vld [vmem:[%s3035_s9 + $0xf0] sm:$0xff]  ;;  %v2537_v39 = vld [vmem:[%s3035_s9 + $0xf8] sm:$0xff]  ;;  %s2880_s9 = scalar_lea.hbm %s2879_s8, 256 }
  0x24   : > { %p2881_p12 = scmp.ne.s32.totalorder %s2879_s8, %s2880_s9  ;;  %p2886_p2 = scmp.lt.s32.totalorder %s2884_s19, %s2880_s9 }
  0x26   : > { %p2882_p13 = pnand %p2881_p12, %p3007_p4  ;;  %p2887_p3 = por %p2886_p2, %p2885_p1 }
  0x28   : > { %p2883_p0 = pneg %p2882_p13 }
  0x2a   : > { %p2888_p5 = pnand %p2887_p3, %p2883_p0 }
  0x31   : > { %2406 = vmatmul.msk.bf16.gmra.mxu0 %vm461_vm2, %v2507_v12  ;;  %2414 = vmatmul.msk.bf16.gmra.mxu1 %vm461_vm2, %v2515_v13 }
  0x32   : > { %2422 = vmatmul.msk.bf16.gmra.mxu2 %vm461_vm2, %v2523_v14  ;;  %2430 = vmatmul.msk.bf16.gmra.mxu3 %vm461_vm2, %v2531_v15 }
  0x41   : > { %2407 = vmatmul.msk.bf16.gmra.mxu0 %vm461_vm2, %v2508_v16  ;;  %2415 = vmatmul.msk.bf16.gmra.mxu1 %vm461_vm2, %v2516_v17 }
  0x42   : > { %2423 = vmatmul.msk.bf16.gmra.mxu2 %vm461_vm2, %v2524_v18  ;;  %2431 = vmatmul.msk.bf16.gmra.mxu3 %vm461_vm2, %v2532_v19 }
  0x51   : > { %2408 = vmatmul.msk.bf16.gmra.mxu0 %vm461_vm2, %v2509_v20  ;;  %2416 = vmatmul.msk.bf16.gmra.mxu1 %vm461_vm2, %v2517_v21 }
  0x52   : > { %2424 = vmatmul.msk.bf16.gmra.mxu2 %vm461_vm2, %v2525_v22  ;;  %2432 = vmatmul.msk.bf16.gmra.mxu3 %vm461_vm2, %v2533_v23 }
  0x61   : > { %2409 = vmatmul.msk.bf16.gmra.mxu0 %vm461_vm2, %v2510_v24  ;;  %2417 = vmatmul.msk.bf16.gmra.mxu1 %vm461_vm2, %v2518_v25 }
  0x62   : > { %2425 = vmatmul.msk.bf16.gmra.mxu2 %vm461_vm2, %v2526_v26  ;;  %2433 = vmatmul.msk.bf16.gmra.mxu3 %vm461_vm2, %v2534_v27 }
  0x71   : > { %2410 = vmatmul.msk.bf16.gmra.mxu0 %vm461_vm2, %v2511_v28  ;;  %2418 = vmatmul.msk.bf16.gmra.mxu1 %vm461_vm2, %v2519_v29 }
  0x72   : > { %2426 = vmatmul.msk.bf16.gmra.mxu2 %vm461_vm2, %v2527_v30  ;;  %2434 = vmatmul.msk.bf16.gmra.mxu3 %vm461_vm2, %v2535_v31 }
  0x81   : > { %2411 = vmatmul.msk.bf16.gmra.mxu0 %vm461_vm2, %v2512_v32  ;;  %2419 = vmatmul.msk.bf16.gmra.mxu1 %vm461_vm2, %v2520_v33 }
  0x82   : > { %2427 = vmatmul.msk.bf16.gmra.mxu2 %vm461_vm2, %v2528_v34  ;;  %2435 = vmatmul.msk.bf16.gmra.mxu3 %vm461_vm2, %v2536_v35 }
  0x91   : > { %2412 = vmatmul.msk.bf16.gmra.mxu0 %vm461_vm2, %v2513_v36  ;;  %2420 = vmatmul.msk.bf16.gmra.mxu1 %vm461_vm2, %v2521_v37 }
  0x92   : > { %2428 = vmatmul.msk.bf16.gmra.mxu2 %vm461_vm2, %v2529_v38  ;;  %2436 = vmatmul.msk.bf16.gmra.mxu3 %vm461_vm2, %v2537_v39 }
  0x9e   : > { %v574_v41 = vpop.f32.mrf.mxu0  ;;  %v614_v42 = vpop.f32.mrf.mxu1 }
  0x9f   : > { %v3107_v43 = vadd.f32 %v3104_v40, %v574_v41  ;;  %v3110_v44 = vadd.f32 %v3104_v40, %v614_v42 }
  0xa1   : > { %v2437_v45 = vmul.f32 -1.442695, %v3107_v43  ;;  %v2453_v46 = vmul.f32 -1.442695, %v3110_v44 }
  0xa3   : > { %2606 = vpow2.f32 %v2437_v45 }
  0xa4   : > { %2608 = vpow2.f32 %v2453_v46 }
  0xa5   : > { %v654_v47 = vpop.f32.mrf.mxu2  ;;  %v694_v48 = vpop.f32.mrf.mxu3 }
  0xa6   : > { %v3115_v49 = vadd.f32 %v3104_v40, %v654_v47  ;;  %v3118_v50 = vadd.f32 %v3104_v40, %v694_v48  ;;  %v576_v51 = vpop.f32.mrf.mxu0  ;;  %v616_v52 = vpop.f32.mrf.mxu1 }
  0xa7   : > { %v3121_v53 = vadd.f32 %v3104_v40, %v576_v51  ;;  %v3124_v54 = vadd.f32 %v3104_v40, %v616_v52 }
  0xa8   : > { %v2469_v55 = vmul.f32 -1.442695, %v3115_v49  ;;  %v2485_v56 = vmul.f32 -1.442695, %v3118_v50 }
  0xa9   : > { %v2607_v57 = vpop.eup %2606  ;;  %v2438_v60 = vmul.f32 -1.442695, %v3121_v53  ;;  %v2454_v62 = vmul.f32 -1.442695, %v3124_v54 }
  0xaa   : > { %v2609_v58 = vpop.eup %2608  ;;  %v3128_v59 = vadd.f32 1.0, %v2607_v57  ;;  %2610 = vpow2.f32 %v2469_v55 }
  0xab   : > { %v3131_v61 = vadd.f32 1.0, %v2609_v58  ;;  %2612 = vpow2.f32 %v2485_v56 }
  0xac   : > { %2614 = vrcp.f32 %v3128_v59  ;;  %v999_v3 = vand.u32 2147483647, %v3128_v59  ;;  %v1001_v4 = vand.u32 2147483648, %v3128_v59  ;;  %vm995_vm3 = vweird.f32 %v3128_v59 }
  0xad   : > { %2616 = vrcp.f32 %v3131_v61  ;;  %v656_v63 = vpop.f32.mrf.mxu2  ;;  %v696_v0 = vpop.f32.mrf.mxu3  ;;  %v1239_v7 = vand.u32 2147483647, %v3131_v61  ;;  %v1241_v11 = vand.u32 2147483648, %v3131_v61  ;;  %vm1235_vm4 = vweird.f32 %v3131_v61 }
  0xae   : > { %2618 = vpow2.f32 %v2438_v60  ;;  %v3137_v1 = vadd.f32 %v3104_v40, %v656_v63  ;;  %v579_v2 = vpop.f32.mrf.mxu0  ;;  %v619_v5 = vpop.f32.mrf.mxu1  ;;  %v3144_v9 = vadd.f32 %v3104_v40, %v696_v0  ;;  %vm3160_vm5 = vcmp.eq.f32.partialorder %v999_v3, 8.507059e+37 }
  0xaf   : > { %2620 = vpow2.f32 %v2454_v62  ;;  %v3150_v13 = vadd.f32 %v3104_v40, %v579_v2  ;;  %v3157_v16 = vadd.f32 %v3104_v40, %v619_v5  ;;  %v1002_v20 = vor.u32 1.1754944e-38, %v1001_v4 }
  0xb0   : > { %v2611_v6 = vpop.eup %2610  ;;  %v2470_v8 = vmul.f32 -1.442695, %v3137_v1  ;;  %vm3166_vm6 = vcmp.eq.f32.partialorder %v1239_v7, 8.507059e+37  ;;  %v2486_v24 = vmul.f32 -1.442695, %v3144_v9  ;;  %v1242_v27 = vor.u32 1.1754944e-38, %v1241_v11 }
  0xb1   : > { %v2613_v10 = vpop.eup %2612  ;;  %v3147_v12 = vadd.f32 1.0, %v2611_v6  ;;  %v3173_v28 = vmul.f32 -1.442695, %v3150_v13  ;;  %v3177_v31 = vmul.f32 -1.442695, %v3157_v16 }
  0xb2   : > { %v2615_v14 = vpop.eup %2614  ;;  %v3154_v15 = vadd.f32 1.0, %v2613_v10 }
  0xb3   : > { %v2617_v17 = vpop.eup %2616  ;;  %v991_v18 = vmul.f32 %v2615_v14, %v3128_v59  ;;  %2622 = vrcp.f32 %v3147_v12  ;;  %vm996_vm7 = vweird.f32 %v2615_v14  ;;  %v1479_v30 = vand.u32 2147483647, %v3147_v12 }
  0xb4   : > { %v2619_v21 = vpop.eup %2618  ;;  %v1231_v22 = vmul.f32 %v2617_v17, %v3131_v61  ;;  %2624 = vpow2.f32 %v2470_v8  ;;  %v1481_v33 = vand.u32 2147483648, %v3147_v12  ;;  %vm1236_vm9 = vweird.f32 %v2617_v17  ;;  %vm997_vm11 = vmor %vm995_vm3, %vm996_vm7 }
  0xb5   : > { %v2621_v25 = vpop.eup %2620  ;;  %v992_v26 = vsub.f32 1.0, %v991_v18  ;;  %2626 = vrcp.f32 %v3154_v15  ;;  %v3180_v34 = vadd.f32 1.0, %v2619_v21  ;;  %v1719_v37 = vand.u32 2147483647, %v3154_v15  ;;  %v659_v48 = vpop.f32.mrf.mxu2  ;;  %vm1237_vm14 = vmor %vm1235_vm4, %vm1236_vm9 }
  0xb6   : > { %v1232_v29 = vsub.f32 1.0, %v1231_v22  ;;  %v3182_v35 = vadd.f32 1.0, %v2621_v25  ;;  %2628 = vpow2.f32 %v2486_v24  ;;  %vm1475_vm10 = vweird.f32 %v3147_v12 }
  0xb7   : > { %v993_v32 = vmul.f32 %v2615_v14, %v992_v26  ;;  %v1721_v41 = vand.u32 2147483648, %v3154_v15  ;;  %2630 = vrcp.f32 %v3180_v34  ;;  %vm3193_vm12 = vcmp.eq.f32.partialorder %v1479_v30, 8.507059e+37 }
  0xb8   : > { %v1233_v36 = vmul.f32 %v2617_v17, %v1232_v29  ;;  %vm1715_vm13 = vweird.f32 %v3154_v15  ;;  %v1482_v55 = vor.u32 1.1754944e-38, %v1481_v33  ;;  %v1014_v56 = vand.u32 2147483647, %v3180_v34 }
  0xb9   : > { %v2623_v38 = vpop.eup %2622  ;;  %v994_v39 = vadd.f32 %v2615_v14, %v993_v32  ;;  %2632 = vrcp.f32 %v3182_v35  ;;  %vm3210_vm15 = vcmp.eq.f32.partialorder %v1719_v37, 8.507059e+37  ;;  %v1722_v0 = vor.u32 1.1754944e-38, %v1721_v41 }
  0xba   : > { %v2625_v42 = vpop.eup %2624  ;;  %v1234_v45 = vadd.f32 %v2617_v17, %v1233_v36  ;;  %v1471_v46 = vmul.f32 %v2623_v38, %v3147_v12  ;;  %v3218_v2 = vadd.f32 %v3104_v40, %v659_v48  ;;  %vm1476_vm0 = vweird.f32 %v2623_v38 }
  0xbb   : > { %v2627_v51 = vpop.eup %2626  ;;  %v998_v52 = vsel %vm997_vm11, %v2615_v14, %v994_v39  ;;  %vm1010_vm1 = vweird.f32 %v3180_v34  ;;  %v3223_v10 = vadd.f32 1.0, %v2625_v42  ;;  %vm3226_vm3 = vcmp.eq.f32.partialorder %v1014_v56, 8.507059e+37  ;;  %vm1477_vm4 = vmor %vm1475_vm10, %vm1476_vm0 }
  0xbc   : > { %v1003_v57 = vsel %vm3160_vm5, %v1002_v20, %v998_v52  ;;  %v1238_v58 = vsel %vm1237_vm14, %v2617_v17, %v1234_v45  ;;  %v1472_v59 = vsub.f32 1.0, %v1471_v46  ;;  %v1711_v60 = vmul.f32 %v2627_v51, %v3154_v15  ;;  %v2629_v3 = vpop.eup %2628  ;;  %v699_v52 = vpop.f32.mrf.mxu3 }
  0xbd   : > { %v1950_v63 = vmul.f32 %v1003_v57, %v3107_v43  ;;  %v1243_v61 = vsel %vm3166_vm6, %v1242_v27, %v1238_v58  ;;  %v2631_v7 = vpop.eup %2630  ;;  %vm1716_vm2 = vweird.f32 %v2627_v51  ;;  %v1016_v43 = vand.u32 2147483648, %v3180_v34 }
  0xbe   : > { %v1966_v4 = vmul.f32 %v1243_v61, %v3110_v44  ;;  %v1473_v5 = vmul.f32 %v2623_v38, %v1472_v59  ;;  %v1712_v6 = vsub.f32 1.0, %v1711_v60  ;;  %v1006_v18 = vmul.f32 %v2631_v7, %v3180_v34  ;;  %vm1717_vm6 = vmor %vm1715_vm13, %vm1716_vm2  ;;  %v581_v60 = vpop.f32.mrf.mxu0 }
  0xbf   : > { %v2014_v8 = vpack.c.bf16 %v1950_v63, %v1950_v63  ;;  %v2633_v19 = vpop.eup %2632  ;;  %vm1250_vm5 = vweird.f32 %v3182_v35  ;;  %v1254_v20 = vand.u32 2147483647, %v3182_v35  ;;  %2634 = vrcp.f32 %v3223_v10 }
  0xc0   : > { %v2030_v11 = vpack.c.bf16 %v1966_v4, %v1966_v4  ;;  %v1474_v14 = vadd.f32 %v2623_v38, %v1473_v5  ;;  %v1713_v17 = vmul.f32 %v2627_v51, %v1712_v6  ;;  %v3241_v21 = vadd.f32 1.0, %v2629_v3 }
  0xc1   : > { %2079 = vst.msk [vmem:[%s3231_s21] sm:$0xf] %vm2078_vm8, %v2014_v8  ;;  %v1007_v24 = vsub.f32 1.0, %v1006_v18  ;;  %v1246_v25 = vmul.f32 %v2633_v19, %v3182_v35  ;;  %vm1011_vm7 = vweird.f32 %v2631_v7  ;;  %vm1251_vm9 = vweird.f32 %v2633_v19 }
  0xc2   : > { %2095 = vst.msk [vmem:[%s3231_s21 + $0x40] sm:$0xf] %vm2078_vm8, %v2030_v11  ;;  %v1478_v22 = vsel %vm1477_vm4, %v2623_v38, %v1474_v14  ;;  %v1714_v23 = vadd.f32 %v2627_v51, %v1713_v17  ;;  %v1256_v12 = vand.u32 2147483648, %v3182_v35  ;;  %v1494_v36 = vand.u32 2147483647, %v3223_v10  ;;  %vm1012_vm10 = vmor %vm1010_vm1, %vm1011_vm7 }
  0xc3   : > { %v1483_v26 = vsel %vm3193_vm12, %v1482_v55, %v1478_v22  ;;  %v1008_v30 = vmul.f32 %v2631_v7, %v1007_v24  ;;  %v1247_v32 = vsub.f32 1.0, %v1246_v25  ;;  %v1496_v37 = vand.u32 2147483648, %v3223_v10  ;;  %vm1252_vm13 = vmor %vm1250_vm5, %vm1251_vm9 }
  0xc4   : > { %v1982_v27 = vmul.f32 %v1483_v26, %v3115_v49  ;;  %v1718_v29 = vsel %vm1717_vm6, %v2627_v51, %v1714_v23  ;;  %2636 = vrcp.f32 %v3241_v21  ;;  %v1017_v49 = vor.u32 1.1754944e-38, %v1016_v43 }
  0xc5   : > { %v1723_v33 = vsel %vm3210_vm15, %v1722_v0, %v1718_v29  ;;  %v1009_v39 = vadd.f32 %v2631_v7, %v1008_v30  ;;  %v1248_v41 = vmul.f32 %v2633_v19, %v1247_v32  ;;  %v2635_v42 = vpop.eup %2634  ;;  %vm3262_vm11 = vcmp.eq.f32.partialorder %v1254_v20, 8.507059e+37  ;;  %v621_v0 = vpop.f32.mrf.mxu1 }
  0xc6   : > { %v2046_v15 = vpack.c.bf16 %v1982_v27, %v1982_v27  ;;  %v1998_v38 = vmul.f32 %v1723_v33, %v3118_v50  ;;  %v1257_v46 = vor.u32 1.1754944e-38, %v1256_v12  ;;  %vm1490_vm12 = vweird.f32 %v3223_v10  ;;  %v701_v27 = vpop.f32.mrf.mxu3 }
  0xc7   : > { %v1013_v50 = vsel %vm1012_vm10, %v2631_v7, %v1009_v39  ;;  %v1249_v48 = vadd.f32 %v2633_v19, %v1248_v41  ;;  %v1486_v51 = vmul.f32 %v2635_v42, %v3223_v10  ;;  %vm1491_vm14 = vweird.f32 %v2635_v42 }
  0xc8   : > { %2111 = vst.msk [vmem:[%s3231_s21 + $0x80] sm:$0xf] %vm2078_vm8, %v2046_v15  ;;  %v2062_v47 = vpack.c.bf16 %v1998_v38, %v1998_v38  ;;  %v1018_v34 = vsel %vm3226_vm3, %v1017_v49, %v1013_v50  ;;  %vm3275_vm15 = vcmp.eq.f32.partialorder %v1494_v36, 8.507059e+37  ;;  %v1497_v56 = vor.u32 1.1754944e-38, %v1496_v37  ;;  %vm1492_vm1 = vmor %vm1490_vm12, %vm1491_vm14  ;;  %v584_v36 = vpop.f32.mrf.mxu0 }
  0xc9   : > { %v1951_v57 = vmul.f32 %v1018_v34, %v3121_v53  ;;  %v1253_v58 = vsel %vm1252_vm13, %v2633_v19, %v1249_v48  ;;  %v1487_v59 = vsub.f32 1.0, %v1486_v51  ;;  %2638 = vpow2.f32 %v3173_v28 }
  0xca   : > { %2127 = vst.msk [vmem:[%s3231_s21 + $0xc0] sm:$0xf] %vm2078_vm8, %v2062_v47  ;;  %v2637_v62 = vpop.eup %2636  ;;  %v1258_v35 = vsel %vm3262_vm11, %v1257_v46, %v1253_v58  ;;  %2640 = vpow2.f32 %v3177_v31  ;;  %v2471_v63 = vmul.f32 -1.442695, %v3218_v2  ;;  %v3288_v61 = vadd.f32 %v3104_v40, %v699_v52 }
  0xcb   : > { %v2015_v3 = vpack.c.bf16 %v1951_v57, %v1951_v57  ;;  %v1967_v53 = vmul.f32 %v1258_v35, %v3124_v54  ;;  %v1488_v4 = vmul.f32 %v2635_v42, %v1487_v59  ;;  %v1726_v28 = vmul.f32 %v2637_v62, %v3241_v21  ;;  %v661_v54 = vpop.f32.mrf.mxu2 }
  0xcc   : > { %vm1730_vm0 = vweird.f32 %v3241_v21  ;;  %2642 = vpow2.f32 %v2471_v63  ;;  %v2487_v5 = vmul.f32 -1.442695, %v3288_v61  ;;  %v3295_v31 = vadd.f32 %v3104_v40, %v581_v60 }
  0xcd   : > { %2080 = vst.msk [vmem:[%s3231_s21 + $0x4] sm:$0xf] %vm2078_vm8, %v2015_v3  ;;  %v2031_v6 = vpack.c.bf16 %v1967_v53, %v1967_v53  ;;  %v1489_v7 = vadd.f32 %v2635_v42, %v1488_v4  ;;  %v1727_v8 = vsub.f32 1.0, %v1726_v28  ;;  %v3300_v43 = vadd.f32 %v3104_v40, %v621_v0 }
  0xce   : > { %v1734_v11 = vand.u32 2147483647, %v3241_v21  ;;  %v1736_v14 = vand.u32 2147483648, %v3241_v21  ;;  %2644 = vpow2.f32 %v2487_v5  ;;  %v2440_v17 = vmul.f32 -1.442695, %v3295_v31 }
  0xcf   : > { %v2639_v18 = vpop.eup %2638  ;;  %2096 = vst.msk [vmem:[%s3231_s21 + $0x44] sm:$0xf] %vm2078_vm8, %v2031_v6  ;;  %v1493_v44 = vsel %vm1492_vm1, %v2635_v42, %v1489_v7  ;;  %v1728_v19 = vmul.f32 %v2637_v62, %v1727_v8  ;;  %vm1731_vm2 = vweird.f32 %v2637_v62  ;;  %v2456_v20 = vmul.f32 -1.442695, %v3300_v43 }
  0xd0   : > { %v2641_v22 = vpop.eup %2640  ;;  %v1498_v10 = vsel %vm3275_vm15, %v1497_v56, %v1493_v44  ;;  %v3313_v23 = vadd.f32 1.0, %v2639_v18  ;;  %2646 = vpow2.f32 %v2440_v17  ;;  %v3316_v24 = vadd.f32 %v3104_v40, %v661_v54  ;;  %vm1732_vm3 = vmor %vm1730_vm0, %vm1731_vm2 }
  0xd1   : > { %v1983_v25 = vmul.f32 %v1498_v10, %v3137_v1  ;;  %v1729_v26 = vadd.f32 %v2637_v62, %v1728_v19  ;;  %v3319_v12 = vadd.f32 1.0, %v2641_v22  ;;  %2648 = vpow2.f32 %v2456_v20 }
  0xd2   : > { %v2643_v29 = vpop.eup %2642  ;;  %v1737_v30 = vor.u32 1.1754944e-38, %v1736_v14  ;;  %2650 = vrcp.f32 %v3313_v23  ;;  %vm1735_vm4 = vcmp.eq.f32.partialorder %v1734_v11, 8.507059e+37  ;;  %v1029_v15 = vand.u32 2147483647, %v3313_v23  ;;  %v704_v14 = vpop.f32.mrf.mxu3 }
  0xd3   : > { %v2047_v32 = vpack.c.bf16 %v1983_v25, %v1983_v25  ;;  %v1733_v33 = vsel %vm1732_vm3, %v2637_v62, %v1729_v26  ;;  %2652 = vrcp.f32 %v3319_v12  ;;  %v2472_v38 = vmul.f32 -1.442695, %v3316_v24 }
  0xd4   : > { %v2645_v1 = vpop.eup %2644  ;;  %v1738_v37 = vsel %vm1735_vm4, %v1737_v30, %v1733_v33  ;;  %v3328_v39 = vadd.f32 %v3104_v40, %v701_v27  ;;  %v1031_v41 = vand.u32 2147483648, %v3313_v23  ;;  %v3334_v42 = vadd.f32 1.0, %v2643_v29 }
  0xd5   : > { %2112 = vst.msk [vmem:[%s3231_s21 + $0x84] sm:$0xf] %vm2078_vm8, %v2047_v32  ;;  %v1999_v21 = vmul.f32 %v1738_v37, %v3144_v9  ;;  %v3336_v49 = vadd.f32 1.0, %v2645_v1  ;;  %v1269_v46 = vand.u32 2147483647, %v3319_v12  ;;  %v1271_v47 = vand.u32 2147483648, %v3319_v12 }
  0xd6   : > { %v2647_v45 = vpop.eup %2646  ;;  %v3341_v50 = vadd.f32 %v3104_v40, %v584_v36  ;;  %2654 = vrcp.f32 %v3334_v42  ;;  %vm1025_vm5 = vweird.f32 %v3313_v23  ;;  %vm1265_vm6 = vweird.f32 %v3319_v12 }
  0xd7   : > { %v2649_v48 = vpop.eup %2648  ;;  %v2063_v51 = vpack.c.bf16 %v1999_v21, %v1999_v21  ;;  %2656 = vrcp.f32 %v3336_v49  ;;  %v2488_v52 = vmul.f32 -1.442695, %v3328_v39  ;;  %vm3351_vm7 = vcmp.eq.f32.partialorder %v1029_v15, 8.507059e+37 }
  0xd8   : > { %v2651_v9 = vpop.eup %2650  ;;  %v1032_v57 = vor.u32 1.1754944e-38, %v1031_v41  ;;  %2658 = vpow2.f32 %v2472_v38  ;;  %vm3356_vm9 = vcmp.eq.f32.partialorder %v1269_v46, 8.507059e+37  ;;  %v1272_v60 = vor.u32 1.1754944e-38, %v1271_v47 }
  0xd9   : > { %v2653_v34 = vpop.eup %2652  ;;  %2128 = vst.msk [vmem:[%s3231_s21 + $0xc4] sm:$0xf] %vm2078_vm8, %v2063_v51  ;;  %v1021_v55 = vmul.f32 %v2651_v9, %v3313_v23  ;;  %v1509_v62 = vand.u32 2147483647, %v3334_v42  ;;  %v3362_v35 = vmul.f32 -1.442695, %v3341_v50  ;;  %vm1505_vm10 = vweird.f32 %v3334_v42  ;;  %v624_v51 = vpop.f32.mrf.mxu1 }
  0xda   : > { %v1261_v58 = vmul.f32 %v2653_v34, %v3319_v12  ;;  %v1511_v0 = vand.u32 2147483648, %v3334_v42  ;;  %v1749_v3 = vand.u32 2147483647, %v3336_v49  ;;  %v3366_v53 = vadd.f32 1.0, %v2647_v45 }
  0xdb   : > { %v1022_v63 = vsub.f32 1.0, %v1021_v55  ;;  %v1751_v28 = vand.u32 2147483648, %v3336_v49  ;;  %v3370_v5 = vadd.f32 1.0, %v2649_v48  ;;  %2660 = vpow2.f32 %v2488_v52 }
  0xdc   : > { %v1262_v4 = vsub.f32 1.0, %v1261_v58  ;;  %v2655_v6 = vpop.eup %2654  ;;  %vm1026_vm11 = vweird.f32 %v2651_v9  ;;  %vm1745_vm12 = vweird.f32 %v3336_v49  ;;  %2662 = vrcp.f32 %v3366_v53 }
  0xdd   : > { %v1023_v7 = vmul.f32 %v2651_v9, %v1022_v63  ;;  %v2657_v8 = vpop.eup %2656  ;;  %vm1266_vm13 = vweird.f32 %v2653_v34  ;;  %v1501_v11 = vmul.f32 %v2655_v6, %v3334_v42  ;;  %vm3375_vm14 = vcmp.eq.f32.partialorder %v1509_v62, 8.507059e+37  ;;  %vm1027_vm0 = vmor %vm1025_vm5, %vm1026_vm11 }
  0xde   : > { %v1263_v54 = vmul.f32 %v2653_v34, %v1262_v4  ;;  %v2659_v17 = vpop.eup %2658  ;;  %v1512_v44 = vor.u32 1.1754944e-38, %v1511_v0  ;;  %v1741_v19 = vmul.f32 %v2657_v8, %v3336_v49  ;;  %vm3380_vm15 = vcmp.eq.f32.partialorder %v1749_v3, 8.507059e+37  ;;  %vm1267_vm1 = vmor %vm1265_vm6, %vm1266_vm13 }
  0xdf   : > { %v1024_v18 = vadd.f32 %v2651_v9, %v1023_v7  ;;  %v1502_v10 = vsub.f32 1.0, %v1501_v11  ;;  %v1752_v25 = vor.u32 1.1754944e-38, %v1751_v28  ;;  %2664 = vrcp.f32 %v3370_v5 }
  0xe0   : > { %v1264_v22 = vadd.f32 %v2653_v34, %v1263_v54  ;;  %vm1506_vm2 = vweird.f32 %v2655_v6  ;;  %v1742_v27 = vsub.f32 1.0, %v1741_v19  ;;  %v1044_v29 = vand.u32 2147483647, %v3366_v53 }
  0xe1   : > { %v1028_v26 = vsel %vm1027_vm0, %v2651_v9, %v1024_v18  ;;  %v2661_v30 = vpop.eup %2660  ;;  %v1503_v23 = vmul.f32 %v2655_v6, %v1502_v10  ;;  %v1046_v36 = vand.u32 2147483648, %v3366_v53  ;;  %vm1746_vm3 = vweird.f32 %v2657_v8  ;;  %vm1507_vm4 = vmor %vm1505_vm10, %vm1506_vm2  ;;  %v586_v10 = vpop.f32.mrf.mxu0 }
  0xe2   : > { %v1033_v32 = vsel %vm3351_vm7, %v1032_v57, %v1028_v26  ;;  %v1268_v33 = vsel %vm1267_vm1, %v2653_v34, %v1264_v22  ;;  %v2663_v1 = vpop.eup %2662  ;;  %v1743_v12 = vmul.f32 %v2657_v8, %v1742_v27  ;;  %v1284_v45 = vand.u32 2147483647, %v3370_v5  ;;  %vm1747_vm5 = vmor %vm1745_vm12, %vm1746_vm3 }
  0xe3   : > { %v1952_v37 = vmul.f32 %v1033_v32, %v3150_v13  ;;  %v1273_v15 = vsel %vm3356_vm9, %v1272_v60, %v1268_v33  ;;  %v1504_v21 = vadd.f32 %v2655_v6, %v1503_v23  ;;  %v1036_v41 = vmul.f32 %v2663_v1, %v3366_v53  ;;  %v664_v60 = vpop.f32.mrf.mxu2 }
  0xe4   : > { %v1968_v38 = vmul.f32 %v1273_v15, %v3157_v16  ;;  %v1744_v13 = vadd.f32 %v2657_v8, %v1743_v12  ;;  %v1286_v47 = vand.u32 2147483648, %v3370_v5  ;;  %v3403_v48 = vadd.f32 1.0, %v2659_v17 }
  0xe5   : > { %v2016_v46 = vpack.c.bf16 %v1952_v37, %v1952_v37  ;;  %v2665_v9 = vpop.eup %2664  ;;  %v1508_v52 = vsel %vm1507_vm4, %v2655_v6, %v1504_v21  ;;  %v1037_v34 = vsub.f32 1.0, %v1036_v41  ;;  %v3407_v55 = vadd.f32 1.0, %v2661_v30 }
  0xe6   : > { %v2032_v16 = vpack.c.bf16 %v1968_v38, %v1968_v38  ;;  %v1513_v42 = vsel %vm3375_vm14, %v1512_v44, %v1508_v52  ;;  %v1748_v56 = vsel %vm1747_vm5, %v2657_v8, %v1744_v13  ;;  %vm1041_vm6 = vweird.f32 %v2663_v1 }
  0xe7   : > { %2081 = vst.msk [vmem:[%s3231_s21 + $0x8] sm:$0xf] %vm2078_vm8, %v2016_v46  ;;  %v1276_v57 = vmul.f32 %v2665_v9, %v3370_v5  ;;  %v1984_v58 = vmul.f32 %v1513_v42, %v3218_v2  ;;  %v1753_v49 = vsel %vm3380_vm15, %v1752_v25, %v1748_v56  ;;  %v1038_v59 = vmul.f32 %v2663_v1, %v1037_v34  ;;  %v626_v25 = vpop.f32.mrf.mxu1 }
  0xe8   : > { %2097 = vst.msk [vmem:[%s3231_s21 + $0x48] sm:$0xf] %vm2078_vm8, %v2032_v16  ;;  %2666 = vrcp.f32 %v3403_v48  ;;  %v2000_v62 = vmul.f32 %v1753_v49, %v3288_v61  ;;  %vm1040_vm7 = vweird.f32 %v3366_v53  ;;  %v3423_v0 = vadd.f32 %v3104_v40, %v624_v51 }
  0xe9   : > { %v1277_v63 = vsub.f32 1.0, %v1276_v57  ;;  %v2048_v3 = vpack.c.bf16 %v1984_v58, %v1984_v58  ;;  %v1039_v4 = vadd.f32 %v2663_v1, %v1038_v59  ;;  %vm1045_vm9 = vcmp.eq.f32.partialorder %v1044_v29, 8.507059e+37  ;;  %vm1042_vm10 = vmor %vm1040_vm7, %vm1041_vm6 }
  0xea   : > { %2668 = vrcp.f32 %v3407_v55  ;;  %v2064_v2 = vpack.c.bf16 %v2000_v62, %v2000_v62  ;;  %v1047_v28 = vor.u32 1.1754944e-38, %v1046_v36  ;;  %vm1281_vm11 = vweird.f32 %v2665_v9 }
  0xeb   : > { %v1278_v6 = vmul.f32 %v2665_v9, %v1277_v63  ;;  %2113 = vst.msk [vmem:[%s3231_s21 + $0x88] sm:$0xf] %vm2078_vm8, %v2048_v3  ;;  %v1043_v61 = vsel %vm1042_vm10, %v2663_v1, %v1039_v4  ;;  %vm1280_vm12 = vweird.f32 %v3370_v5  ;;  %vm3430_vm13 = vcmp.eq.f32.partialorder %v1284_v45, 8.507059e+37  ;;  %v666_v12 = vpop.f32.mrf.mxu2 }
  0xec   : > { %v1287_v7 = vor.u32 1.1754944e-38, %v1286_v47  ;;  %2129 = vst.msk [vmem:[%s3231_s21 + $0xc8] sm:$0xf] %vm2078_vm8, %v2064_v2  ;;  %v1048_v8 = vsel %vm1045_vm9, %v1047_v28, %v1043_v61  ;;  %vm1520_vm14 = vweird.f32 %v3403_v48  ;;  %2670 = vpow2.f32 %v3362_v35  ;;  %vm1282_vm15 = vmor %vm1280_vm12, %vm1281_vm11 }
  0xed   : > { %v1279_v54 = vadd.f32 %v2665_v9, %v1278_v6  ;;  %v2457_v11 = vmul.f32 -1.442695, %v3423_v0  ;;  %v1953_v18 = vmul.f32 %v1048_v8, %v3295_v31  ;;  %v1524_v5 = vand.u32 2147483647, %v3403_v48 }
  0xee   : > { %v2667_v17 = vpop.eup %2666  ;;  %v1526_v44 = vand.u32 2147483648, %v3403_v48  ;;  %v3444_v19 = vadd.f32 %v3104_v40, %v664_v60  ;;  %v1764_v35 = vand.u32 2147483647, %v3407_v55  ;;  %v3452_v30 = vadd.f32 %v3104_v40, %v704_v14  ;;  %v706_v60 = vpop.f32.mrf.mxu3 }
  0xef   : > { %v1283_v20 = vsel %vm1282_vm15, %v2665_v9, %v1279_v54  ;;  %v1516_v22 = vmul.f32 %v2667_v17, %v3403_v48  ;;  %2672 = vpow2.f32 %v2457_v11  ;;  %v2017_v31 = vpack.c.bf16 %v1953_v18, %v1953_v18 }
  0xf0   : > { %v2669_v26 = vpop.eup %2668  ;;  %v1288_v27 = vsel %vm3430_vm13, %v1287_v7, %v1283_v20  ;;  %v2473_v29 = vmul.f32 -1.442695, %v3444_v19  ;;  %v1766_v36 = vand.u32 2147483648, %v3407_v55  ;;  %v2489_v1 = vmul.f32 -1.442695, %v3452_v30 }
  0xf1   : > { %v1969_v32 = vmul.f32 %v1288_v27, %v3300_v43  ;;  %v1517_v33 = vsub.f32 1.0, %v1516_v22  ;;  %v1756_v23 = vmul.f32 %v2669_v26, %v3407_v55  ;;  %2082 = vst.msk [vmem:[%s3231_s21 + $0xc] sm:$0xf] %vm2078_vm8, %v2017_v31  ;;  %v3461_v37 = vadd.f32 %v3104_v40, %v586_v10 }
  0xf2   : > { %2674 = vpow2.f32 %v2473_v29  ;;  %v3464_v15 = vadd.f32 %v3104_v40, %v626_v25  ;;  %v2671_v38 = vpop.eup %2670  ;;  %vm1521_vm0 = vweird.f32 %v2667_v17  ;;  %vm1761_vm1 = vweird.f32 %v2669_v26 }
  0xf3   : > { %v2033_v43 = vpack.c.bf16 %v1969_v32, %v1969_v32  ;;  %v1518_v21 = vmul.f32 %v2667_v17, %v1517_v33  ;;  %v1757_v41 = vsub.f32 1.0, %v1756_v23  ;;  %v3466_v45 = vadd.f32 1.0, %v2671_v38  ;;  %vm1522_vm2 = vmor %vm1520_vm14, %vm1521_vm0 }
  0xf4   : > { %2676 = vpow2.f32 %v2489_v1  ;;  %v2442_v46 = vmul.f32 -1.442695, %v3461_v37  ;;  %v2458_v13 = vmul.f32 -1.442695, %v3464_v15  ;;  %v3473_v16 = vadd.f32 %v3104_v40, %v666_v12 }
  0xf5   : > { %v2673_v47 = vpop.eup %2672  ;;  %2098 = vst.msk [vmem:[%s3231_s21 + $0x4c] sm:$0xf] %vm2078_vm8, %v2033_v43  ;;  %v1519_v51 = vadd.f32 %v2667_v17, %v1518_v21  ;;  %v1758_v9 = vmul.f32 %v2669_v26, %v1757_v41  ;;  %vm1525_vm3 = vcmp.eq.f32.partialorder %v1524_v5, 8.507059e+37  ;;  %v1527_v52 = vor.u32 1.1754944e-38, %v1526_v44 }
  0xf6   : > { %vm1760_vm4 = vweird.f32 %v3407_v55  ;;  %2678 = vrcp.f32 %v3466_v45  ;;  %v3479_v56 = vadd.f32 1.0, %v2673_v47  ;;  %vm1765_vm6 = vcmp.eq.f32.partialorder %v1764_v35, 8.507059e+37  ;;  %v709_v10 = vpop.f32.mrf.mxu3 }
  0xf7   : > { %v1523_v34 = vsel %vm1522_vm2, %v2667_v17, %v1519_v51  ;;  %v1759_v42 = vadd.f32 %v2669_v26, %v1758_v9  ;;  %2680 = vpow2.f32 %v2442_v46  ;;  %vm1762_vm5 = vmor %vm1760_vm4, %vm1761_vm1  ;;  %v1767_v49 = vor.u32 1.1754944e-38, %v1766_v36 }
  0xf8   : > { %v2675_v57 = vpop.eup %2674  ;;  %v1528_v58 = vsel %vm1525_vm3, %v1527_v52, %v1523_v34  ;;  %2682 = vpow2.f32 %v2458_v13  ;;  %v2474_v55 = vmul.f32 -1.442695, %v3473_v16  ;;  %v1059_v3 = vand.u32 2147483647, %v3466_v45 }
  0xf9   : > { %v1985_v48 = vmul.f32 %v1528_v58, %v3316_v24  ;;  %v1763_v59 = vsel %vm1762_vm5, %v2669_v26, %v1759_v42  ;;  %2684 = vrcp.f32 %v3479_v56  ;;  %v1061_v4 = vand.u32 2147483648, %v3466_v45 }
  0xfa   : > { %v2677_v62 = vpop.eup %2676  ;;  %v1768_v63 = vsel %vm1765_vm6, %v1767_v49, %v1763_v59  ;;  %v3486_v2 = vadd.f32 1.0, %v2675_v57  ;;  %v1299_v53 = vand.u32 2147483647, %v3479_v56  ;;  %v1301_v7 = vand.u32 2147483648, %v3479_v56 }
  0xfb   : > { %v2049_v28 = vpack.c.bf16 %v1985_v48, %v1985_v48  ;;  %v2001_v6 = vmul.f32 %v1768_v63, %v3328_v39  ;;  %v3489_v61 = vadd.f32 1.0, %v2677_v62  ;;  %v3495_v8 = vadd.f32 %v3104_v40, %v706_v60 }
  0xfc   : > { %v2679_v24 = vpop.eup %2678  ;;  %2686 = vrcp.f32 %v3486_v2  ;;  %vm1055_vm7 = vweird.f32 %v3466_v45  ;;  %vm3501_vm9 = vcmp.eq.f32.partialorder %v1059_v3, 8.507059e+37  ;;  %v1062_v18 = vor.u32 1.1754944e-38, %v1061_v4 }
  0xfd   : > { %v2681_v54 = vpop.eup %2680  ;;  %2114 = vst.msk [vmem:[%s3231_s21 + $0x8c] sm:$0xf] %vm2078_vm8, %v2049_v28  ;;  %v2065_v11 = vpack.c.bf16 %v2001_v6, %v2001_v6  ;;  %v1051_v14 = vmul.f32 %v2679_v24, %v3466_v45  ;;  %2688 = vpow2.f32 %v2474_v55  ;;  %v1539_v5 = vand.u32 2147483647, %v3486_v2 }
  0xfe   : > { %v2683_v39 = vpop.eup %2682  ;;  %2690 = vrcp.f32 %v3489_v61  ;;  %vm1295_vm10 = vweird.f32 %v3479_v56  ;;  %v1541_v20 = vand.u32 2147483648, %v3486_v2  ;;  %v3511_v22 = vadd.f32 1.0, %v2681_v54 }
  0xff   : > { %v2685_v40 = vpop.eup %2684  ;;  %2130 = vst.msk [vmem:[%s3231_s21 + $0xcc] sm:$0xf] %vm2078_vm8, %v2065_v11  ;;  %v1052_v44 = vsub.f32 1.0, %v1051_v14  ;;  %vm3514_vm11 = vcmp.eq.f32.partialorder %v1299_v53, 8.507059e+37  ;;  %v1302_v25 = vor.u32 1.1754944e-38, %v1301_v7  ;;  %v1781_v26 = vand.u32 2147483648, %v3489_v61  ;;  %v669_v53 = vpop.f32.mrf.mxu2 }
 0x100   : > { %v1291_v35 = vmul.f32 %v2685_v40, %v3479_v56  ;;  %vm1056_vm12 = vweird.f32 %v2679_v24  ;;  %v1779_v27 = vand.u32 2147483647, %v3489_v61  ;;  %2692 = vrcp.f32 %v3511_v22 }
 0x101   : > { %v1053_v31 = vmul.f32 %v2679_v24, %v1052_v44  ;;  %vm1535_vm13 = vweird.f32 %v3486_v2  ;;  %v1076_v33 = vand.u32 2147483648, %v3511_v22  ;;  %v3523_v23 = vadd.f32 1.0, %v2683_v39  ;;  %vm1057_vm1 = vmor %vm1055_vm7, %vm1056_vm12 }
 0x102   : > { %v2687_v29 = vpop.eup %2686  ;;  %v1292_v32 = vsub.f32 1.0, %v1291_v35  ;;  %vm1296_vm14 = vweird.f32 %v2685_v40  ;;  %vm3526_vm15 = vcmp.eq.f32.partialorder %v1539_v5, 8.507059e+37  ;;  %v1542_v43 = vor.u32 1.1754944e-38, %v1541_v20 }
 0x103   : > { %v2689_v36 = vpop.eup %2688  ;;  %v1054_v1 = vadd.f32 %v2679_v24, %v1053_v31  ;;  %v1531_v12 = vmul.f32 %v2687_v29, %v3486_v2  ;;  %vm1775_vm0 = vweird.f32 %v3489_v61  ;;  %v1782_v46 = vor.u32 1.1754944e-38, %v1781_v26  ;;  %vm1297_vm5 = vmor %vm1295_vm10, %vm1296_vm14 }
 0x104   : > { %v2691_v21 = vpop.eup %2690  ;;  %v1293_v41 = vmul.f32 %v2685_v40, %v1292_v32  ;;  %v1074_v13 = vand.u32 2147483647, %v3511_v22  ;;  %2694 = vrcp.f32 %v3523_v23  ;;  %vm1536_vm2 = vweird.f32 %v2687_v29 }
 0x105   : > { %v1058_v47 = vsel %vm1057_vm1, %v2679_v24, %v1054_v1  ;;  %v1532_v51 = vsub.f32 1.0, %v1531_v12  ;;  %v1771_v9 = vmul.f32 %v2691_v21, %v3489_v61  ;;  %vm3537_vm3 = vcmp.eq.f32.partialorder %v1779_v27, 8.507059e+37  ;;  %v629_v24 = vpop.f32.mrf.mxu1  ;;  %v3593_v1 = vld [vmem:[%s4504_s2] ss:$0 sm:$0xff] }
 0x106   : > { %v1063_v34 = vsel %vm3501_vm9, %v1062_v18, %v1058_v47  ;;  %v1294_v45 = vadd.f32 %v2685_v40, %v1293_v41  ;;  %vm1070_vm4 = vweird.f32 %v3511_v22  ;;  %v1077_v42 = vor.u32 1.1754944e-38, %v1076_v33  ;;  %v2693_v58 = vpop.eup %2692  ;;  %vm1537_vm9 = vmor %vm1535_vm13, %vm1536_vm2 }
 0x107   : > { %v3544_v57 = vadd.f32 1.0, %v2689_v36  ;;  %v1954_v49 = vmul.f32 %v1063_v34, %v3341_v50  ;;  %v1533_v48 = vmul.f32 %v2687_v29, %v1532_v51  ;;  %v1772_v59 = vsub.f32 1.0, %v1771_v9  ;;  %v589_v50 = vpop.f32.mrf.mxu0  ;;  %v671_v52 = vpop.f32.mrf.mxu2 }
 0x108   : > { %vm1776_vm6 = vweird.f32 %v2691_v21  ;;  %v1298_v55 = vsel %vm1297_vm5, %v2685_v40, %v1294_v45  ;;  %v1066_v60 = vmul.f32 %v2693_v58, %v3511_v22  ;;  %vm3551_vm7 = vcmp.eq.f32.partialorder %v1074_v13, 8.507059e+37 }
 0x109   : > { %v1314_v63 = vand.u32 2147483647, %v3523_v23  ;;  %v1316_v3 = vand.u32 2147483648, %v3523_v23  ;;  %v2018_v4 = vpack.c.bf16 %v1954_v49, %v1954_v49  ;;  %v1303_v56 = vsel %vm3514_vm11, %v1302_v25, %v1298_v55  ;;  %vm1777_vm12 = vmor %vm1775_vm0, %vm1776_vm6 }
 0x10a   : > { %v1534_v28 = vadd.f32 %v2687_v29, %v1533_v48  ;;  %v1773_v6 = vmul.f32 %v2691_v21, %v1772_v59  ;;  %v2695_v7 = vpop.eup %2694  ;;  %v1970_v54 = vmul.f32 %v1303_v56, %v3423_v0  ;;  %v1067_v11 = vsub.f32 1.0, %v1066_v60 }
 0x10b   : > { %vm1310_vm10 = vweird.f32 %v3523_v23  ;;  %2696 = vrcp.f32 %v3544_v57  ;;  %2083 = vst.msk [vmem:[%s3231_s21 + $0x10] sm:$0xf] %vm2078_vm8, %v2018_v4  ;;  %vm1071_vm11 = vweird.f32 %v2693_v58  ;;  %v1306_v17 = vmul.f32 %v2695_v7, %v3523_v23  ;;  %v711_v4 = vpop.f32.mrf.mxu3 }
 0x10c   : > { %v1538_v14 = vsel %vm1537_vm9, %v2687_v29, %v1534_v28  ;;  %v1774_v39 = vadd.f32 %v2691_v21, %v1773_v6  ;;  %v2034_v18 = vpack.c.bf16 %v1970_v54, %v1970_v54  ;;  %v1068_v2 = vmul.f32 %v2693_v58, %v1067_v11 }
 0x10d   : > { %v1543_v0 = vsel %vm3526_vm15, %v1542_v43, %v1538_v14  ;;  %vm3573_vm13 = vcmp.eq.f32.partialorder %v1314_v63, 8.507059e+37  ;;  %v1307_v20 = vsub.f32 1.0, %v1306_v17  ;;  %v1317_v35 = vor.u32 1.1754944e-38, %v1316_v3  ;;  %vm1072_vm15 = vmor %vm1070_vm4, %vm1071_vm11  ;;  %v631_v23 = vpop.f32.mrf.mxu1 }
 0x10e   : > { %v1986_v40 = vmul.f32 %v1543_v0, %v3444_v19  ;;  %v1778_v44 = vsel %vm1777_vm12, %v2691_v21, %v1774_v39  ;;  %2099 = vst.msk [vmem:[%s3231_s21 + $0x50] sm:$0xf] %vm2078_vm8, %v2034_v18  ;;  %v1069_v26 = vadd.f32 %v2693_v58, %v1068_v2  ;;  %vm1311_vm14 = vweird.f32 %v2695_v7 }
 0x10f   : > { %v1783_v25 = vsel %vm3537_vm3, %v1782_v46, %v1778_v44  ;;  %v2490_v61 = vmul.f32 -1.442695, %v3495_v8  ;;  %v1308_v19 = vmul.f32 %v2695_v7, %v1307_v20  ;;  %vm1550_vm0 = vweird.f32 %v3544_v57  ;;  %vm1312_vm1 = vmor %vm1310_vm10, %vm1311_vm14  ;;  %v591_v13 = vpop.f32.mrf.mxu0 }
 0x110   : > { %v2050_v31 = vpack.c.bf16 %v1986_v40, %v1986_v40  ;;  %v2002_v27 = vmul.f32 %v1783_v25, %v3452_v30  ;;  %v1554_v29 = vand.u32 2147483647, %v3544_v57  ;;  %v1073_v33 = vsel %vm1072_vm15, %v2693_v58, %v1069_v26 }
 0x111   : > { %v2697_v32 = vpop.eup %2696  ;;  %v1556_v36 = vand.u32 2147483648, %v3544_v57  ;;  %2698 = vpow2.f32 %v2490_v61  ;;  %v3596_v30 = vadd.f32 %v3593_v1, %v589_v50  ;;  %v1078_v12 = vsel %vm3551_vm7, %v1077_v42, %v1073_v33 }
 0x112   : > { %2115 = vst.msk [vmem:[%s3231_s21 + $0x90] sm:$0xf] %vm2078_vm8, %v2050_v31  ;;  %v2066_v22 = vpack.c.bf16 %v2002_v27, %v2002_v27  ;;  %v1309_v38 = vadd.f32 %v2695_v7, %v1308_v19  ;;  %v1546_v43 = vmul.f32 %v2697_v32, %v3544_v57  ;;  %v1955_v21 = vmul.f32 %v1078_v12, %v3461_v37 }
 0x113   : > { %vm1551_vm2 = vweird.f32 %v2697_v32  ;;  %v2443_v41 = vmul.f32 -1.442695, %v3596_v30  ;;  %v3609_v46 = vadd.f32 %v3593_v1, %v629_v24  ;;  %v3614_v9 = vadd.f32 %v3593_v1, %v669_v53 }
 0x114   : > { %2131 = vst.msk [vmem:[%s3231_s21 + $0xd0] sm:$0xf] %vm2078_vm8, %v2066_v22  ;;  %v1313_v47 = vsel %vm1312_vm1, %v2695_v7, %v1309_v38  ;;  %v1547_v51 = vsub.f32 1.0, %v1546_v43  ;;  %v3617_v37 = vadd.f32 %v3593_v1, %v709_v10  ;;  %v2019_v34 = vpack.c.bf16 %v1955_v21, %v1955_v21  ;;  %vm1552_vm3 = vmor %vm1550_vm0, %vm1551_vm2 }
 0x115   : > { %v1318_v45 = vsel %vm3573_vm13, %v1317_v35, %v1313_v47  ;;  %2700 = vpow2.f32 %v2443_v41  ;;  %v2459_v42 = vmul.f32 -1.442695, %v3609_v46  ;;  %v2475_v48 = vmul.f32 -1.442695, %v3614_v9  ;;  %v634_v33 = vpop.f32.mrf.mxu1 }
 0x116   : > { %v1971_v58 = vmul.f32 %v1318_v45, %v3464_v15  ;;  %v1548_v49 = vmul.f32 %v2697_v32, %v1547_v51  ;;  %v2491_v59 = vmul.f32 -1.442695, %v3617_v37  ;;  %2084 = vst.msk [vmem:[%s3231_s21 + $0x14] sm:$0xf] %vm2078_vm8, %v2019_v34  ;;  %v3628_v60 = vadd.f32 %v3593_v1, %v591_v13 }
 0x117   : > { %v2699_v55 = vpop.eup %2698  ;;  %2702 = vpow2.f32 %v2459_v42  ;;  %v3631_v62 = vadd.f32 %v3593_v1, %v631_v23  ;;  %v3634_v63 = vadd.f32 %v3593_v1, %v671_v52  ;;  %v1557_v56 = vor.u32 1.1754944e-38, %v1556_v36  ;;  %v594_v20 = vpop.f32.mrf.mxu0 }
 0x118   : > { %v2035_v15 = vpack.c.bf16 %v1971_v58, %v1971_v58  ;;  %v1549_v3 = vadd.f32 %v2697_v32, %v1548_v49  ;;  %v3636_v50 = vadd.f32 1.0, %v2699_v55  ;;  %2704 = vpow2.f32 %v2475_v48 }
 0x119   : > { %2706 = vpow2.f32 %v2491_v59  ;;  %v2444_v28 = vmul.f32 -1.442695, %v3628_v60  ;;  %vm1555_vm4 = vcmp.eq.f32.partialorder %v1554_v29, 8.507059e+37  ;;  %v2460_v7 = vmul.f32 -1.442695, %v3631_v62 }
 0x11a   : > { %2100 = vst.msk [vmem:[%s3231_s21 + $0x54] sm:$0xf] %vm2078_vm8, %v2035_v15  ;;  %v1553_v6 = vsel %vm1552_vm3, %v2697_v32, %v1549_v3  ;;  %2708 = vrcp.f32 %v3636_v50  ;;  %v3647_v54 = vadd.f32 %v3593_v1, %v711_v4  ;;  %v2476_v14 = vmul.f32 -1.442695, %v3634_v63 }
 0x11b   : > { %v2701_v24 = vpop.eup %2700  ;;  %v1558_v53 = vsel %vm1555_vm4, %v1557_v56, %v1553_v6  ;;  %2710 = vpow2.f32 %v2444_v28  ;;  %v1794_v0 = vand.u32 2147483647, %v3636_v50  ;;  %v1796_v2 = vand.u32 2147483648, %v3636_v50 }
 0x11c   : > { %v1987_v57 = vmul.f32 %v1558_v53, %v3473_v16  ;;  %v3650_v11 = vadd.f32 1.0, %v2701_v24  ;;  %v2492_v16 = vmul.f32 -1.442695, %v3647_v54  ;;  %vm1790_vm5 = vweird.f32 %v3636_v50 }
 0x11d   : > { %v2703_v39 = vpop.eup %2702  ;;  %vm3669_vm6 = vcmp.eq.f32.partialorder %v1794_v0, 8.507059e+37  ;;  %v3676_v27 = vadd.f32 %v3593_v1, %v594_v20  ;;  %v1797_v32 = vor.u32 1.1754944e-38, %v1796_v2  ;;  %v3695_v45 = vadd.f32 %v3593_v1, %v634_v33 }
 0x11e   : > { %v2705_v17 = vpop.eup %2704  ;;  %v2051_v18 = vpack.c.bf16 %v1987_v57, %v1987_v57  ;;  %2712 = vrcp.f32 %v3650_v11  ;;  %v3656_v40 = vadd.f32 1.0, %v2703_v39  ;;  %v1089_v26 = vand.u32 2147483647, %v3650_v11 }
 0x11f   : > { %v2707_v5 = vpop.eup %2706  ;;  %v3658_v44 = vadd.f32 1.0, %v2705_v17  ;;  %2714 = vpow2.f32 %v2460_v7  ;;  %v1091_v31 = vand.u32 2147483648, %v3650_v11  ;;  %vm1085_vm7 = vweird.f32 %v3650_v11 }
 0x120   : > { %v2709_v35 = vpop.eup %2708  ;;  %2116 = vst.msk [vmem:[%s3231_s21 + $0x94] sm:$0xf] %vm2078_vm8, %v2051_v18  ;;  %v3663_v10 = vadd.f32 1.0, %v2707_v5  ;;  %2716 = vpow2.f32 %v2476_v14  ;;  %v1329_v22 = vand.u32 2147483647, %v3656_v40  ;;  %v1331_v12 = vand.u32 2147483648, %v3656_v40 }
 0x121   : > { %v1786_v25 = vmul.f32 %v2709_v35, %v3636_v50  ;;  %2718 = vrcp.f32 %v3656_v40  ;;  %v2711_v19 = vpop.eup %2710  ;;  %v1571_v38 = vand.u32 2147483648, %v3658_v44  ;;  %vm1791_vm9 = vweird.f32 %v2709_v35 }
 0x122   : > { %2720 = vrcp.f32 %v3658_v44  ;;  %vm3684_vm10 = vcmp.eq.f32.partialorder %v1089_v26, 8.507059e+37  ;;  %v1569_v47 = vand.u32 2147483647, %v3658_v44  ;;  %v1092_v23 = vor.u32 1.1754944e-38, %v1091_v31  ;;  %vm1792_vm13 = vmor %vm1790_vm5, %vm1791_vm9 }
 0x123   : > { %v1787_v29 = vsub.f32 1.0, %v1786_v25  ;;  %2722 = vpow2.f32 %v2492_v16  ;;  %v3689_v52 = vadd.f32 1.0, %v2711_v19  ;;  %v3692_v34 = vmul.f32 -1.442695, %v3676_v27 }
 0x124   : > { %v2713_v36 = vpop.eup %2712  ;;  %2724 = vrcp.f32 %v3663_v10  ;;  %vm1325_vm11 = vweird.f32 %v3656_v40  ;;  %vm1565_vm12 = vweird.f32 %v3658_v44  ;;  %vm3703_vm15 = vcmp.eq.f32.partialorder %v1329_v22, 8.507059e+37 }
 0x125   : > { %v2715_v43 = vpop.eup %2714  ;;  %v1788_v21 = vmul.f32 %v2709_v35, %v1787_v29  ;;  %v1081_v41 = vmul.f32 %v2713_v36, %v3650_v11  ;;  %vm1086_vm14 = vweird.f32 %v2713_v36  ;;  %v1332_v15 = vor.u32 1.1754944e-38, %v1331_v12 }
 0x126   : > { %v2717_v51 = vpop.eup %2716  ;;  %v1572_v3 = vor.u32 1.1754944e-38, %v1571_v38  ;;  %vm3710_vm0 = vcmp.eq.f32.partialorder %v1569_v47, 8.507059e+37  ;;  %vm1805_vm1 = vweird.f32 %v3663_v10  ;;  %v1809_v50 = vand.u32 2147483647, %v3663_v10  ;;  %vm1087_vm2 = vmor %vm1085_vm7, %vm1086_vm14 }
 0x127   : > { %v2719_v42 = vpop.eup %2718  ;;  %v1789_v58 = vadd.f32 %v2709_v35, %v1788_v21  ;;  %v1082_v49 = vsub.f32 1.0, %v1081_v41  ;;  %2726 = vrcp.f32 %v3689_v52  ;;  %v3719_v14 = vadd.f32 1.0, %v2715_v43 }
 0x128   : > { %v2721_v48 = vpop.eup %2720  ;;  %v1321_v59 = vmul.f32 %v2719_v42, %v3656_v40  ;;  %vm1326_vm3 = vweird.f32 %v2719_v42  ;;  %v1811_v5 = vand.u32 2147483648, %v3663_v10  ;;  %v1104_v61 = vand.u32 2147483647, %v3689_v52 }
 0x129   : > { %v3707_v4 = vpop.eup %2722  ;;  %v1793_v56 = vsel %vm1792_vm13, %v2709_v35, %v1789_v58  ;;  %v1083_v28 = vmul.f32 %v2713_v36, %v1082_v49  ;;  %v1561_v6 = vmul.f32 %v2721_v48, %v3658_v44  ;;  %vm1566_vm4 = vweird.f32 %v2721_v48 }
 0x12a   : > { %v2725_v53 = vpop.eup %2724  ;;  %v1798_v7 = vsel %vm3669_vm6, %v1797_v32, %v1793_v56  ;;  %v1322_v57 = vsub.f32 1.0, %v1321_v59  ;;  %vm1327_vm6 = vmor %vm1325_vm11, %vm1326_vm3  ;;  %2728 = vrcp.f32 %v3719_v14  ;;  %vm3739_vm9 = vcmp.eq.f32.partialorder %v1809_v50, 8.507059e+37 }
 0x12b   : > { %v2003_v39 = vmul.f32 %v1798_v7, %v3495_v8  ;;  %v1084_v17 = vadd.f32 %v2713_v36, %v1083_v28  ;;  %v1562_v18 = vsub.f32 1.0, %v1561_v6  ;;  %v1801_v0 = vmul.f32 %v2725_v53, %v3663_v10  ;;  %vm1567_vm7 = vmor %vm1565_vm12, %vm1566_vm4 }
 0x12c   : > { %v1323_v2 = vmul.f32 %v2719_v42, %v1322_v57  ;;  %vm1806_vm5 = vweird.f32 %v2725_v53  ;;  %v1106_v41 = vand.u32 2147483648, %v3689_v52  ;;  %vm1100_vm11 = vweird.f32 %v3689_v52 }
 0x12d   : > { %v2067_v16 = vpack.c.bf16 %v2003_v39, %v2003_v39  ;;  %v1088_v20 = vsel %vm1087_vm2, %v2713_v36, %v1084_v17  ;;  %v1563_v35 = vmul.f32 %v2721_v48, %v1562_v18  ;;  %v1802_v25 = vsub.f32 1.0, %v1801_v0  ;;  %v2727_v29 = vpop.eup %2726  ;;  %v714_v17 = vpop.f32.mrf.mxu3 }
 0x12e   : > { %v1093_v8 = vsel %vm3684_vm10, %v1092_v23, %v1088_v20  ;;  %v1324_v26 = vadd.f32 %v2719_v42, %v1323_v2  ;;  %v1812_v36 = vor.u32 1.1754944e-38, %v1811_v5  ;;  %vm1807_vm10 = vmor %vm1805_vm1, %vm1806_vm5  ;;  %v1096_v44 = vmul.f32 %v2727_v29, %v3689_v52  ;;  %v596_v18 = vpop.f32.mrf.mxu0 }
 0x12f   : > { %2132 = vst.msk [vmem:[%s3231_s21 + $0xd4] sm:$0xf] %vm2078_vm8, %v2067_v16  ;;  %v1956_v11 = vmul.f32 %v1093_v8, %v3596_v30  ;;  %v1564_v31 = vadd.f32 %v2721_v48, %v1563_v35  ;;  %v1803_v19 = vmul.f32 %v2725_v53, %v1802_v25  ;;  %v3743_v30 = vadd.f32 1.0, %v2717_v51 }
 0x130   : > { %v1328_v32 = vsel %vm1327_vm6, %v2719_v42, %v1324_v26  ;;  %vm3759_vm12 = vcmp.eq.f32.partialorder %v1104_v61, 8.507059e+37  ;;  %v1097_v23 = vsub.f32 1.0, %v1096_v44  ;;  %v2729_v42 = vpop.eup %2728  ;;  %vm1101_vm13 = vweird.f32 %v2727_v29 }
 0x131   : > { %v2020_v40 = vpack.c.bf16 %v1956_v11, %v1956_v11  ;;  %v1333_v22 = vsel %vm3703_vm15, %v1332_v15, %v1328_v32  ;;  %v1568_v12 = vsel %vm1567_vm7, %v2721_v48, %v1564_v31  ;;  %v1804_v38 = vadd.f32 %v2725_v53, %v1803_v19  ;;  %vm1102_vm15 = vmor %vm1100_vm11, %vm1101_vm13  ;;  %v636_v19 = vpop.f32.mrf.mxu1 }
 0x132   : > { %v1972_v43 = vmul.f32 %v1333_v22, %v3609_v46  ;;  %v1573_v21 = vsel %vm3710_vm0, %v1572_v3, %v1568_v12  ;;  %2730 = vrcp.f32 %v3743_v30  ;;  %v1346_v48 = vand.u32 2147483648, %v3719_v14 }
 0x133   : > { %2085 = vst.msk [vmem:[%s3231_s21 + $0x18] sm:$0xf] %vm2078_vm8, %v2020_v40  ;;  %v1988_v13 = vmul.f32 %v1573_v21, %v3614_v9  ;;  %v1808_v47 = vsel %vm1807_vm10, %v2725_v53, %v1804_v38  ;;  %v1344_v9 = vand.u32 2147483647, %v3719_v14  ;;  %v1098_v59 = vmul.f32 %v2727_v29, %v1097_v23 }
 0x134   : > { %v2036_v51 = vpack.c.bf16 %v1972_v43, %v1972_v43  ;;  %v1813_v10 = vsel %vm3739_vm9, %v1812_v36, %v1808_v47  ;;  %v1107_v55 = vor.u32 1.1754944e-38, %v1106_v41  ;;  %v1336_v15 = vmul.f32 %v2729_v42, %v3719_v14 }
 0x135   : > { %v2052_v58 = vpack.c.bf16 %v1988_v13, %v1988_v13  ;;  %v2004_v49 = vmul.f32 %v1813_v10, %v3617_v37  ;;  %vm1340_vm14 = vweird.f32 %v3719_v14  ;;  %v3776_v56 = vadd.f32 1.0, %v3707_v4  ;;  %v674_v37 = vpop.f32.mrf.mxu2  ;;  %v716_v53 = vpop.f32.mrf.mxu3 }
 0x136   : > { %2101 = vst.msk [vmem:[%s3231_s21 + $0x58] sm:$0xf] %vm2078_vm8, %v2036_v51  ;;  %2732 = vpow2.f32 %v3692_v34  ;;  %v1099_v28 = vadd.f32 %v2727_v29, %v1098_v59  ;;  %v1337_v6 = vsub.f32 1.0, %v1336_v15  ;;  %v1584_v24 = vand.u32 2147483647, %v3743_v30 }
 0x137   : > { %2117 = vst.msk [vmem:[%s3231_s21 + $0x98] sm:$0xf] %vm2078_vm8, %v2052_v58  ;;  %v2068_v3 = vpack.c.bf16 %v2004_v49, %v2004_v49  ;;  %v2461_v50 = vmul.f32 -1.442695, %v3695_v45  ;;  %vm1341_vm0 = vweird.f32 %v2729_v42  ;;  %vm3785_vm1 = vcmp.eq.f32.partialorder %v1344_v9, 8.507059e+37 }
 0x138   : > { %v1347_v4 = vor.u32 1.1754944e-38, %v1346_v48  ;;  %2734 = vrcp.f32 %v3776_v56  ;;  %v2731_v34 = vpop.eup %2730  ;;  %v1103_v7 = vsel %vm1102_vm15, %v2727_v29, %v1099_v28  ;;  %v1338_v57 = vmul.f32 %v2729_v42, %v1337_v6  ;;  %vm1342_vm4 = vmor %vm1340_vm14, %vm1341_vm0 }
 0x139   : > { %2133 = vst.msk [vmem:[%s3231_s21 + $0xd8] sm:$0xf] %vm2078_vm8, %v2068_v3  ;;  %2736 = vpow2.f32 %v2461_v50  ;;  %v3791_v39 = vadd.f32 %v3593_v1, %v674_v37  ;;  %v1108_v52 = vsel %vm3759_vm12, %v1107_v55, %v1103_v7  ;;  %v1576_v0 = vmul.f32 %v2731_v34, %v3743_v30 }
 0x13a   : > { %vm1580_vm2 = vweird.f32 %v3743_v30  ;;  %v1586_v2 = vand.u32 2147483648, %v3743_v30  ;;  %v1957_v5 = vmul.f32 %v1108_v52, %v3628_v60  ;;  %v1339_v16 = vadd.f32 %v2729_v42, %v1338_v57 }
 0x13b   : > { %vm3799_vm3 = vcmp.eq.f32.partialorder %v1584_v24, 8.507059e+37  ;;  %v2477_v35 = vmul.f32 -1.442695, %v3791_v39  ;;  %v1577_v8 = vsub.f32 1.0, %v1576_v0  ;;  %vm1581_vm5 = vweird.f32 %v2731_v34 }
 0x13c   : > { %v2733_v25 = vpop.eup %2732  ;;  %v3808_v26 = vadd.f32 %v3593_v1, %v714_v17  ;;  %v3811_v60 = vadd.f32 %v3593_v1, %v596_v18  ;;  %v2021_v61 = vpack.c.bf16 %v1957_v5, %v1957_v5  ;;  %v1343_v11 = vsel %vm1342_vm4, %v2729_v42, %v1339_v16  ;;  %vm1582_vm6 = vmor %vm1580_vm2, %vm1581_vm5 }
 0x13d   : > { %v3813_v31 = vadd.f32 1.0, %v2733_v25  ;;  %2738 = vpow2.f32 %v2477_v35  ;;  %v1348_v14 = vsel %vm3785_vm1, %v1347_v4, %v1343_v11  ;;  %v1578_v32 = vmul.f32 %v2731_v34, %v1577_v8  ;;  %v676_v3 = vpop.f32.mrf.mxu2 }
 0x13e   : > { %v2735_v29 = vpop.eup %2734  ;;  %v2493_v33 = vmul.f32 -1.442695, %v3808_v26  ;;  %v2446_v36 = vmul.f32 -1.442695, %v3811_v60  ;;  %2086 = vst.msk [vmem:[%s3231_s21 + $0x1c] sm:$0xf] %vm2078_vm8, %v2021_v61  ;;  %v1973_v22 = vmul.f32 %v1348_v14, %v3631_v62  ;;  %v3827_v41 = vadd.f32 %v3593_v1, %v636_v19 }
 0x13f   : > { %v2737_v40 = vpop.eup %2736  ;;  %v1587_v12 = vor.u32 1.1754944e-38, %v1586_v2  ;;  %v1816_v38 = vmul.f32 %v2735_v29, %v3776_v56  ;;  %2740 = vrcp.f32 %v3813_v31  ;;  %v1579_v43 = vadd.f32 %v2731_v34, %v1578_v32 }
 0x140   : > { %v1824_v21 = vand.u32 2147483647, %v3776_v56  ;;  %v1826_v44 = vand.u32 2147483648, %v3776_v56  ;;  %v2037_v13 = vpack.c.bf16 %v1973_v22, %v1973_v22  ;;  %v3832_v47 = vadd.f32 1.0, %v2737_v40  ;;  %v599_v22 = vpop.f32.mrf.mxu0 }
 0x141   : > { %v1817_v62 = vsub.f32 1.0, %v1816_v38  ;;  %2742 = vpow2.f32 %v2493_v33  ;;  %v1583_v46 = vsel %vm1582_vm6, %v2731_v34, %v1579_v43  ;;  %v1119_v51 = vand.u32 2147483647, %v3813_v31 }
 0x142   : > { %v1121_v10 = vand.u32 2147483648, %v3813_v31  ;;  %2744 = vpow2.f32 %v2446_v36  ;;  %2102 = vst.msk [vmem:[%s3231_s21 + $0x5c] sm:$0xf] %vm2078_vm8, %v2037_v13  ;;  %v1588_v42 = vsel %vm3799_vm3, %v1587_v12, %v1583_v46  ;;  %vm1821_vm7 = vweird.f32 %v2735_v29 }
 0x143   : > { %v2739_v23 = vpop.eup %2738  ;;  %v1818_v58 = vmul.f32 %v2735_v29, %v1817_v62  ;;  %2746 = vrcp.f32 %v3832_v47  ;;  %v1989_v30 = vmul.f32 %v1588_v42, %v3634_v63  ;;  %vm1820_vm9 = vweird.f32 %v3776_v56 }
 0x144   : > { %vm3843_vm10 = vcmp.eq.f32.partialorder %v1824_v21, 8.507059e+37  ;;  %v3847_v9 = vadd.f32 1.0, %v2739_v23  ;;  %v1827_v55 = vor.u32 1.1754944e-38, %v1826_v44  ;;  %vm1115_vm11 = vweird.f32 %v3813_v31  ;;  %vm1822_vm12 = vmor %vm1820_vm9, %vm1821_vm7 }
 0x145   : > { %v2741_v48 = vpop.eup %2740  ;;  %v1819_v59 = vadd.f32 %v2735_v29, %v1818_v58  ;;  %v2462_v15 = vmul.f32 -1.442695, %v3827_v41  ;;  %v2053_v37 = vpack.c.bf16 %v1989_v30, %v1989_v30  ;;  %vm3852_vm13 = vcmp.eq.f32.partialorder %v1119_v51, 8.507059e+37 }
 0x146   : > { %v1111_v63 = vmul.f32 %v2741_v48, %v3813_v31  ;;  %v1122_v28 = vor.u32 1.1754944e-38, %v1121_v10  ;;  %vm1355_vm14 = vweird.f32 %v3832_v47  ;;  %v1359_v50 = vand.u32 2147483647, %v3832_v47 }
 0x147   : > { %v2743_v6 = vpop.eup %2742  ;;  %v1823_v24 = vsel %vm1822_vm12, %v2735_v29, %v1819_v59  ;;  %2748 = vrcp.f32 %v3847_v9  ;;  %2118 = vst.msk [vmem:[%s3231_s21 + $0x9c] sm:$0xf] %vm2078_vm8, %v2053_v37  ;;  %v1361_v57 = vand.u32 2147483648, %v3832_v47  ;;  %v3865_v17 = vadd.f32 %v3593_v1, %v676_v3 }
 0x148   : > { %v2745_v4 = vpop.eup %2744  ;;  %v1828_v34 = vsel %vm3843_vm10, %v1827_v55, %v1823_v24  ;;  %v1112_v7 = vsub.f32 1.0, %v1111_v63  ;;  %v3868_v0 = vadd.f32 1.0, %v2743_v6  ;;  %2750 = vpow2.f32 %v2462_v15  ;;  %v639_v24 = vpop.f32.mrf.mxu1 }
 0x149   : > { %v2747_v18 = vpop.eup %2746  ;;  %v2005_v52 = vmul.f32 %v1828_v34, %v3647_v54  ;;  %v3870_v2 = vadd.f32 1.0, %v2745_v4  ;;  %vm1116_vm15 = vweird.f32 %v2741_v48  ;;  %v3874_v20 = vadd.f32 %v3593_v1, %v716_v53  ;;  %v679_v34 = vpop.f32.mrf.mxu2 }
 0x14a   : > { %v1113_v5 = vmul.f32 %v2741_v48, %v1112_v7  ;;  %v1351_v16 = vmul.f32 %v2747_v18, %v3832_v47  ;;  %v1599_v25 = vand.u32 2147483647, %v3847_v9  ;;  %v1601_v8 = vand.u32 2147483648, %v3847_v9  ;;  %vm1117_vm1 = vmor %vm1115_vm11, %vm1116_vm15  ;;  %v719_v7 = vpop.f32.mrf.mxu3 }
 0x14b   : > { %v2069_v35 = vpack.c.bf16 %v2005_v52, %v2005_v52  ;;  %2752 = vrcp.f32 %v3868_v0  ;;  %vm3879_vm0 = vcmp.eq.f32.partialorder %v1359_v50, 8.507059e+37  ;;  %v1362_v19 = vor.u32 1.1754944e-38, %v1361_v57 }
 0x14c   : > { %v1114_v54 = vadd.f32 %v2741_v48, %v1113_v5  ;;  %v1352_v61 = vsub.f32 1.0, %v1351_v16  ;;  %vm1356_vm2 = vweird.f32 %v2747_v18  ;;  %vm1595_vm3 = vweird.f32 %v3847_v9 }
 0x14d   : > { %v2749_v29 = vpop.eup %2748  ;;  %2134 = vst.msk [vmem:[%s3231_s21 + $0xdc] sm:$0xf] %vm2078_vm8, %v2069_v35  ;;  %v1841_v14 = vand.u32 2147483648, %v3868_v0  ;;  %2754 = vrcp.f32 %v3870_v2  ;;  %v1839_v40 = vand.u32 2147483647, %v3868_v0  ;;  %vm3894_vm4 = vcmp.eq.f32.partialorder %v1599_v25, 8.507059e+37  ;;  %vm1357_vm6 = vmor %vm1355_vm14, %vm1356_vm2  ;;  %v601_v35 = vpop.f32.mrf.mxu0 }
 0x14e   : > { %v1118_v32 = vsel %vm1117_vm1, %v2741_v48, %v1114_v54  ;;  %v1353_v33 = vmul.f32 %v2747_v18, %v1352_v61  ;;  %v1591_v36 = vmul.f32 %v2749_v29, %v3847_v9  ;;  %v2751_v12 = vpop.eup %2750  ;;  %v1602_v43 = vor.u32 1.1754944e-38, %v1601_v8 }
 0x14f   : > { %v1123_v38 = vsel %vm3852_vm13, %v1122_v28, %v1118_v32  ;;  %v1134_v21 = vand.u32 2147483647, %v3870_v2  ;;  %vm1835_vm5 = vweird.f32 %v3868_v0  ;;  %v1136_v46 = vand.u32 2147483648, %v3870_v2 }
 0x150   : > { %v1958_v44 = vmul.f32 %v1123_v38, %v3676_v27  ;;  %v1354_v13 = vadd.f32 %v2747_v18, %v1353_v33  ;;  %v1592_v62 = vsub.f32 1.0, %v1591_v36  ;;  %vm1596_vm7 = vweird.f32 %v2749_v29 }
 0x151   : > { %v2753_v51 = vpop.eup %2752  ;;  %v1842_v10 = vor.u32 1.1754944e-38, %v1841_v14  ;;  %v3905_v23 = vadd.f32 1.0, %v2751_v12  ;;  %v2478_v42 = vmul.f32 -1.442695, %v3865_v17  ;;  %vm3909_vm9 = vcmp.eq.f32.partialorder %v1839_v40, 8.507059e+37  ;;  %vm1597_vm11 = vmor %vm1595_vm3, %vm1596_vm7 }
 0x152   : > { %v2022_v58 = vpack.c.bf16 %v1958_v44, %v1958_v44  ;;  %v1358_v27 = vsel %vm1357_vm6, %v2747_v18, %v1354_v13  ;;  %v1593_v30 = vmul.f32 %v2749_v29, %v1592_v62  ;;  %v1831_v49 = vmul.f32 %v2753_v51, %v3868_v0 }
 0x153   : > { %vm1130_vm10 = vweird.f32 %v3870_v2  ;;  %v2755_v47 = vpop.eup %2754  ;;  %v1363_v59 = vsel %vm3879_vm0, %v1362_v19, %v1358_v27  ;;  %2756 = vrcp.f32 %v3905_v23  ;;  %v2494_v55 = vmul.f32 -1.442695, %v3874_v20 }
 0x154   : > { %v3919_v15 = vadd.f32 %v3593_v1, %v599_v22  ;;  %2087 = vst.msk [vmem:[%s3231_s21 + $0x20] sm:$0xf] %vm2078_vm8, %v2022_v58  ;;  %v1974_v3 = vmul.f32 %v1363_v59, %v3695_v45  ;;  %v1594_v37 = vadd.f32 %v2749_v29, %v1593_v30  ;;  %v1832_v63 = vsub.f32 1.0, %v1831_v49 }
 0x155   : > { %v1126_v56 = vmul.f32 %v2755_v47, %v3870_v2  ;;  %vm1836_vm12 = vweird.f32 %v2753_v51  ;;  %vm3928_vm13 = vcmp.eq.f32.partialorder %v1134_v21, 8.507059e+37  ;;  %v1137_v6 = vor.u32 1.1754944e-38, %v1136_v46 }
 0x156   : > { %2758 = vpow2.f32 %v2478_v42  ;;  %v2038_v50 = vpack.c.bf16 %v1974_v3, %v1974_v3  ;;  %v1598_v53 = vsel %vm1597_vm11, %v2749_v29, %v1594_v37  ;;  %v1833_v45 = vmul.f32 %v2753_v51, %v1832_v63  ;;  %vm1837_vm15 = vmor %vm1835_vm5, %vm1836_vm12 }
 0x157   : > { %v1127_v4 = vsub.f32 1.0, %v1126_v56  ;;  %v1603_v57 = vsel %vm3894_vm4, %v1602_v43, %v1598_v53  ;;  %vm1131_vm14 = vweird.f32 %v2755_v47  ;;  %v1374_v9 = vand.u32 2147483647, %v3905_v23 }
 0x158   : > { %2760 = vpow2.f32 %v2494_v55  ;;  %2103 = vst.msk [vmem:[%s3231_s21 + $0x60] sm:$0xf] %vm2078_vm8, %v2038_v50  ;;  %v1990_v18 = vmul.f32 %v1603_v57, %v3791_v39  ;;  %v1834_v52 = vadd.f32 %v2753_v51, %v1833_v45  ;;  %v2447_v16 = vmul.f32 -1.442695, %v3919_v15  ;;  %vm1132_vm0 = vmor %vm1130_vm10, %vm1131_vm14 }
 0x159   : > { %v1128_v5 = vmul.f32 %v2755_v47, %v1127_v4  ;;  %v2757_v25 = vpop.eup %2756  ;;  %v1376_v8 = vand.u32 2147483648, %v3905_v23  ;;  %v3944_v54 = vadd.f32 %v3593_v1, %v639_v24  ;;  %v3947_v61 = vadd.f32 %v3593_v1, %v679_v34 }
 0x15a   : > { %v3950_v39 = vadd.f32 %v3593_v1, %v719_v7  ;;  %v2054_v11 = vpack.c.bf16 %v1990_v18, %v1990_v18  ;;  %v1838_v19 = vsel %vm1837_vm15, %v2753_v51, %v1834_v52  ;;  %v1366_v14 = vmul.f32 %v2757_v25, %v3905_v23 }
 0x15b   : > { %v1129_v29 = vadd.f32 %v2755_v47, %v1128_v5  ;;  %v1843_v0 = vsel %vm3909_vm9, %v1842_v10, %v1838_v19  ;;  %2762 = vpow2.f32 %v2447_v16  ;;  %v2463_v33 = vmul.f32 -1.442695, %v3944_v54 }
 0x15c   : > { %v2759_v32 = vpop.eup %2758  ;;  %v3960_v36 = vadd.f32 %v3593_v1, %v601_v35  ;;  %2119 = vst.msk [vmem:[%s3231_s21 + $0xa0] sm:$0xf] %vm2078_vm8, %v2054_v11  ;;  %v2006_v40 = vmul.f32 %v1843_v0, %v3808_v26  ;;  %v1367_v12 = vsub.f32 1.0, %v1366_v14  ;;  %vm1371_vm1 = vweird.f32 %v2757_v25 }
 0x15d   : > { %v1133_v22 = vsel %vm1132_vm0, %v2755_v47, %v1129_v29  ;;  %v3965_v38 = vadd.f32 1.0, %v2759_v32  ;;  %2764 = vpow2.f32 %v2463_v33  ;;  %v2479_v43 = vmul.f32 -1.442695, %v3947_v61  ;;  %v641_v47 = vpop.f32.mrf.mxu1 }
 0x15e   : > { %v2761_v31 = vpop.eup %2760  ;;  %v1138_v2 = vsel %vm3928_vm13, %v1137_v6, %v1133_v22  ;;  %v2070_v21 = vpack.c.bf16 %v2006_v40, %v2006_v40  ;;  %v1368_v13 = vmul.f32 %v2757_v25, %v1367_v12  ;;  %v2495_v62 = vmul.f32 -1.442695, %v3950_v39  ;;  %v681_v6 = vpop.f32.mrf.mxu2 }
 0x15f   : > { %v1959_v44 = vmul.f32 %v1138_v2, %v3811_v60  ;;  %2766 = vrcp.f32 %v3965_v38  ;;  %v3972_v26 = vadd.f32 1.0, %v2761_v31  ;;  %vm1370_vm2 = vweird.f32 %v3905_v23 }
 0x160   : > { %2135 = vst.msk [vmem:[%s3231_s21 + $0xe0] sm:$0xf] %vm2078_vm8, %v2070_v21  ;;  %v1369_v51 = vadd.f32 %v2757_v25, %v1368_v13  ;;  %2768 = vpow2.f32 %v2479_v43  ;;  %vm1372_vm3 = vmor %vm1370_vm2, %vm1371_vm1  ;;  %v1377_v42 = vor.u32 1.1754944e-38, %v1376_v8  ;;  %v1614_v60 = vand.u32 2147483647, %v3965_v38 }
 0x161   : > { %v2023_v46 = vpack.c.bf16 %v1959_v44, %v1959_v44  ;;  %v2763_v10 = vpop.eup %2762  ;;  %v1616_v58 = vand.u32 2147483648, %v3965_v38  ;;  %2770 = vrcp.f32 %v3972_v26  ;;  %vm1375_vm4 = vcmp.eq.f32.partialorder %v1374_v9, 8.507059e+37 }
 0x162   : > { %v1373_v27 = vsel %vm1372_vm3, %v2757_v25, %v1369_v51  ;;  %v3984_v30 = vadd.f32 1.0, %v2763_v10  ;;  %v2448_v49 = vmul.f32 -1.442695, %v3960_v36  ;;  %2772 = vpow2.f32 %v2495_v62 }
 0x163   : > { %2088 = vst.msk [vmem:[%s3231_s21 + $0x24] sm:$0xf] %vm2078_vm8, %v2023_v46  ;;  %v2765_v23 = vpop.eup %2764  ;;  %v1378_v48 = vsel %vm1375_vm4, %v1377_v42, %v1373_v27  ;;  %vm1610_vm5 = vweird.f32 %v3965_v38  ;;  %v1854_v3 = vand.u32 2147483647, %v3972_v26  ;;  %vm3992_vm6 = vcmp.eq.f32.partialorder %v1614_v60, 8.507059e+37 }
 0x164   : > { %v1975_v55 = vmul.f32 %v1378_v48, %v3827_v41  ;;  %2774 = vrcp.f32 %v3984_v30  ;;  %v1617_v56 = vor.u32 1.1754944e-38, %v1616_v58  ;;  %v1856_v28 = vand.u32 2147483648, %v3972_v26 }
 0x165   : > { %v2767_v59 = vpop.eup %2766  ;;  %vm1850_vm7 = vweird.f32 %v3972_v26  ;;  %v3998_v41 = vadd.f32 1.0, %v2765_v23  ;;  %2776 = vpow2.f32 %v2448_v49  ;;  %v4001_v53 = vadd.f32 %v3593_v1, %v641_v47 }
 0x166   : > { %v1606_v37 = vmul.f32 %v2767_v59, %v3965_v38  ;;  %v2769_v24 = vpop.eup %2768  ;;  %v2039_v50 = vpack.c.bf16 %v1975_v55, %v1975_v55  ;;  %v1149_v34 = vand.u32 2147483647, %v3984_v30  ;;  %v1151_v7 = vand.u32 2147483648, %v3984_v30  ;;  %v721_v55 = vpop.f32.mrf.mxu3 }
 0x167   : > { %v2771_v45 = vpop.eup %2770  ;;  %v4005_v57 = vadd.f32 1.0, %v2769_v24  ;;  %vm4010_vm9 = vcmp.eq.f32.partialorder %v1854_v3, 8.507059e+37  ;;  %2778 = vrcp.f32 %v3998_v41  ;;  %v4016_v52 = vadd.f32 %v3593_v1, %v681_v6 }
 0x168   : > { %v1607_v4 = vsub.f32 1.0, %v1606_v37  ;;  %2104 = vst.msk [vmem:[%s3231_s21 + $0x64] sm:$0xf] %vm2078_vm8, %v2039_v50  ;;  %v1846_v9 = vmul.f32 %v2771_v45, %v3972_v26  ;;  %v2773_v5 = vpop.eup %2772  ;;  %vm1611_vm10 = vweird.f32 %v2767_v59  ;;  %v1857_v35 = vor.u32 1.1754944e-38, %v1856_v28 }
 0x169   : > { %vm1145_vm11 = vweird.f32 %v3984_v30  ;;  %vm1851_vm12 = vweird.f32 %v2771_v45  ;;  %2780 = vrcp.f32 %v4005_v57  ;;  %v2464_v11 = vmul.f32 -1.442695, %v4001_v53  ;;  %vm1612_vm15 = vmor %vm1610_vm5, %vm1611_vm10 }
 0x16a   : > { %v1608_v16 = vmul.f32 %v2767_v59, %v1607_v4  ;;  %v2775_v25 = vpop.eup %2774  ;;  %v1847_v8 = vsub.f32 1.0, %v1846_v9  ;;  %vm4022_vm13 = vcmp.eq.f32.partialorder %v1149_v34, 8.507059e+37  ;;  %v1152_v1 = vor.u32 1.1754944e-38, %v1151_v7  ;;  %vm1852_vm1 = vmor %vm1850_vm7, %vm1851_vm12 }
 0x16b   : > { %v1141_v29 = vmul.f32 %v2775_v25, %v3984_v30  ;;  %vm1385_vm14 = vweird.f32 %v3998_v41  ;;  %v2777_v32 = vpop.eup %2776  ;;  %v1389_v33 = vand.u32 2147483647, %v3998_v41  ;;  %v1391_v40 = vand.u32 2147483648, %v3998_v41 }
 0x16c   : > { %v1609_v19 = vadd.f32 %v2767_v59, %v1608_v16  ;;  %v1848_v0 = vmul.f32 %v2771_v45, %v1847_v8  ;;  %v1629_v22 = vand.u32 2147483647, %v4005_v57  ;;  %vm1146_vm0 = vweird.f32 %v2775_v25 }
 0x16d   : > { %v1142_v31 = vsub.f32 1.0, %v1141_v29  ;;  %v4032_v2 = vadd.f32 1.0, %v2773_v5  ;;  %v2779_v43 = vpop.eup %2778  ;;  %v1631_v38 = vand.u32 2147483648, %v4005_v57  ;;  %2782 = vpow2.f32 %v2464_v11  ;;  %vm1147_vm4 = vmor %vm1145_vm11, %vm1146_vm0 }
 0x16e   : > { %v1613_v12 = vsel %vm1612_vm15, %v2767_v59, %v1609_v19  ;;  %v1849_v44 = vadd.f32 %v2771_v45, %v1848_v0  ;;  %v1381_v46 = vmul.f32 %v2779_v43, %v3998_v41  ;;  %v4042_v51 = vadd.f32 1.0, %v2777_v32 }
 0x16f   : > { %v1618_v21 = vsel %vm3992_vm6, %v1617_v56, %v1613_v12  ;;  %v1143_v62 = vmul.f32 %v2775_v25, %v1142_v31  ;;  %v2781_v10 = vpop.eup %2780  ;;  %vm4044_vm2 = vcmp.eq.f32.partialorder %v1389_v33, 8.507059e+37  ;;  %v1392_v58 = vor.u32 1.1754944e-38, %v1391_v40  ;;  %v684_v12 = vpop.f32.mrf.mxu2 }
 0x170   : > { %v1991_v13 = vmul.f32 %v1618_v21, %v3865_v17  ;;  %v1853_v42 = vsel %vm1852_vm1, %v2771_v45, %v1849_v44  ;;  %vm1625_vm3 = vweird.f32 %v4005_v57  ;;  %2784 = vrcp.f32 %v4032_v2  ;;  %v724_v44 = vpop.f32.mrf.mxu3 }
 0x171   : > { %v1858_v26 = vsel %vm4010_vm9, %v1857_v35, %v1853_v42  ;;  %v1144_v27 = vadd.f32 %v2775_v25, %v1143_v62  ;;  %v1382_v49 = vsub.f32 1.0, %v1381_v46  ;;  %vm1386_vm5 = vweird.f32 %v2779_v43  ;;  %v604_v35 = vpop.f32.mrf.mxu0  ;;  %v4110_v62 = vld [vmem:[%s4504_s2] ss:$0 sm:$0xff] }
 0x172   : > { %v2055_v17 = vpack.c.bf16 %v1991_v13, %v1991_v13  ;;  %v2007_v23 = vmul.f32 %v1858_v26, %v3874_v20  ;;  %v1621_v48 = vmul.f32 %v2781_v10, %v4005_v57  ;;  %vm4057_vm6 = vcmp.eq.f32.partialorder %v1629_v22, 8.507059e+37  ;;  %vm1387_vm10 = vmor %vm1385_vm14, %vm1386_vm5  ;;  %v644_v57 = vpop.f32.mrf.mxu1 }
 0x173   : > { %v1632_v59 = vor.u32 1.1754944e-38, %v1631_v38  ;;  %v1148_v3 = vsel %vm1147_vm4, %v2775_v25, %v1144_v27  ;;  %v1383_v37 = vmul.f32 %v2779_v43, %v1382_v49  ;;  %v1869_v20 = vand.u32 2147483647, %v4032_v2  ;;  %v2783_v30 = vpop.eup %2782 }
 0x174   : > { %2120 = vst.msk [vmem:[%s3231_s21 + $0xa4] sm:$0xf] %vm2078_vm8, %v2055_v17  ;;  %2786 = vrcp.f32 %v4042_v51  ;;  %v2071_v63 = vpack.c.bf16 %v2007_v23, %v2007_v23  ;;  %v1153_v56 = vsel %vm4022_vm13, %v1152_v1, %v1148_v3  ;;  %v1622_v28 = vsub.f32 1.0, %v1621_v48 }
 0x175   : > { %v1871_v6 = vand.u32 2147483648, %v4032_v2  ;;  %v1960_v24 = vmul.f32 %v1153_v56, %v3919_v15  ;;  %v1384_v50 = vadd.f32 %v2779_v43, %v1383_v37  ;;  %vm1626_vm7 = vweird.f32 %v2781_v10 }
 0x176   : > { %vm1865_vm9 = vweird.f32 %v4032_v2  ;;  %v2785_v45 = vpop.eup %2784  ;;  %2136 = vst.msk [vmem:[%s3231_s21 + $0xe4] sm:$0xf] %vm2078_vm8, %v2071_v63  ;;  %v1623_v4 = vmul.f32 %v2781_v10, %v1622_v28  ;;  %v1164_v34 = vand.u32 2147483647, %v4042_v51  ;;  %v1166_v7 = vand.u32 2147483648, %v4042_v51  ;;  %vm1627_vm13 = vmor %vm1625_vm3, %vm1626_vm7 }
 0x177   : > { %v4077_v9 = vadd.f32 1.0, %v2783_v30  ;;  %v2024_v15 = vpack.c.bf16 %v1960_v24, %v1960_v24  ;;  %v1388_v18 = vsel %vm1387_vm10, %v2779_v43, %v1384_v50  ;;  %v1861_v5 = vmul.f32 %v2785_v45, %v4032_v2 }
 0x178   : > { %vm4080_vm11 = vcmp.eq.f32.partialorder %v1869_v20, 8.507059e+37  ;;  %v1393_v41 = vsel %vm4044_vm2, %v1392_v58, %v1388_v18  ;;  %v1624_v25 = vadd.f32 %v2781_v10, %v1623_v4  ;;  %v1872_v8 = vor.u32 1.1754944e-38, %v1871_v6  ;;  %v686_v18 = vpop.f32.mrf.mxu2  ;;  %v726_v0 = vpop.f32.mrf.mxu3 }
 0x179   : > { %vm1160_vm12 = vweird.f32 %v4042_v51  ;;  %v2480_v11 = vmul.f32 -1.442695, %v4016_v52  ;;  %2089 = vst.msk [vmem:[%s3231_s21 + $0x28] sm:$0xf] %vm2078_vm8, %v2024_v15  ;;  %v1976_v29 = vmul.f32 %v1393_v41, %v3944_v54  ;;  %v1862_v14 = vsub.f32 1.0, %v1861_v5  ;;  %v606_v37 = vpop.f32.mrf.mxu0 }
 0x17a   : > { %v2787_v19 = vpop.eup %2786  ;;  %vm1866_vm14 = vweird.f32 %v2785_v45  ;;  %2788 = vrcp.f32 %v4077_v9  ;;  %v1628_v1 = vsel %vm1627_vm13, %v2781_v10, %v1624_v25  ;;  %vm4096_vm15 = vcmp.eq.f32.partialorder %v1164_v34, 8.507059e+37  ;;  %v646_v34 = vpop.f32.mrf.mxu1 }
 0x17b   : > { %v1156_v32 = vmul.f32 %v2787_v19, %v4042_v51  ;;  %v1167_v33 = vor.u32 1.1754944e-38, %v1166_v7  ;;  %v2040_v40 = vpack.c.bf16 %v1976_v29, %v1976_v29  ;;  %v1633_v54 = vsel %vm4057_vm6, %v1632_v59, %v1628_v1  ;;  %vm1867_vm1 = vmor %vm1865_vm9, %vm1866_vm14 }
 0x17c   : > { %v1863_v22 = vmul.f32 %v2785_v45, %v1862_v14  ;;  %vm1161_vm0 = vweird.f32 %v2787_v19  ;;  %v1992_v31 = vmul.f32 %v1633_v54, %v3947_v61  ;;  %v1404_v21 = vand.u32 2147483647, %v4077_v9 }
 0x17d   : > { %v1157_v43 = vsub.f32 1.0, %v1156_v32  ;;  %2790 = vpow2.f32 %v2480_v11  ;;  %2105 = vst.msk [vmem:[%s3231_s21 + $0x68] sm:$0xf] %vm2078_vm8, %v2040_v40  ;;  %v1406_v13 = vand.u32 2147483648, %v4077_v9  ;;  %v4113_v46 = vadd.f32 %v4110_v62, %v721_v55  ;;  %vm1162_vm3 = vmor %vm1160_vm12, %vm1161_vm0 }
 0x17e   : > { %v1864_v38 = vadd.f32 %v2785_v45, %v1863_v22  ;;  %v4116_v61 = vadd.f32 %v4110_v62, %v604_v35  ;;  %v2056_v10 = vpack.c.bf16 %v1992_v31, %v1992_v31  ;;  %v4122_v60 = vadd.f32 %v4110_v62, %v644_v57 }
 0x17f   : > { %v1158_v42 = vmul.f32 %v2787_v19, %v1157_v43  ;;  %v4125_v58 = vadd.f32 %v4110_v62, %v684_v12  ;;  %v2496_v27 = vmul.f32 -1.442695, %v4113_v46  ;;  %v4130_v23 = vadd.f32 %v4110_v62, %v724_v44 }
 0x180   : > { %v2789_v17 = vpop.eup %2788  ;;  %v1868_v26 = vsel %vm1867_vm1, %v2785_v45, %v1864_v38  ;;  %v2449_v49 = vmul.f32 -1.442695, %v4116_v61  ;;  %2121 = vst.msk [vmem:[%s3231_s21 + $0xa8] sm:$0xf] %vm2078_vm8, %v2056_v10  ;;  %v2465_v55 = vmul.f32 -1.442695, %v4122_v60  ;;  %v4150_v50 = vadd.f32 %v4110_v62, %v606_v37 }
 0x181   : > { %v1873_v2 = vsel %vm4080_vm11, %v1872_v8, %v1868_v26  ;;  %v1159_v48 = vadd.f32 %v2787_v19, %v1158_v42  ;;  %v1396_v47 = vmul.f32 %v2789_v17, %v4077_v9  ;;  %vm1401_vm2 = vweird.f32 %v2789_v17 }
 0x182   : > { %v2008_v59 = vmul.f32 %v1873_v2, %v3950_v39  ;;  %2792 = vpow2.f32 %v2496_v27  ;;  %v2481_v3 = vmul.f32 -1.442695, %v4125_v58  ;;  %v2497_v56 = vmul.f32 -1.442695, %v4130_v23 }
 0x183   : > { %v2791_v20 = vpop.eup %2790  ;;  %v1163_v30 = vsel %vm1162_vm3, %v2787_v19, %v1159_v48  ;;  %v1397_v63 = vsub.f32 1.0, %v1396_v47  ;;  %2794 = vpow2.f32 %v2449_v49  ;;  %vm1400_vm4 = vweird.f32 %v4077_v9  ;;  %v609_v48 = vpop.f32.mrf.mxu0 }
 0x184   : > { %v2072_v28 = vpack.c.bf16 %v2008_v59, %v2008_v59  ;;  %v1168_v39 = vsel %vm4096_vm15, %v1167_v33, %v1163_v30  ;;  %v4146_v6 = vadd.f32 1.0, %v2791_v20  ;;  %2796 = vpow2.f32 %v2465_v55  ;;  %vm1402_vm5 = vmor %vm1400_vm4, %vm1401_vm2 }
 0x185   : > { %v1961_v51 = vmul.f32 %v1168_v39, %v3960_v36  ;;  %v1398_v24 = vmul.f32 %v2789_v17, %v1397_v63  ;;  %2798 = vpow2.f32 %v2481_v3  ;;  %vm1405_vm6 = vcmp.eq.f32.partialorder %v1404_v21, 8.507059e+37  ;;  %v689_v63 = vpop.f32.mrf.mxu2 }
 0x186   : > { %2137 = vst.msk [vmem:[%s3231_s21 + $0xe8] sm:$0xf] %vm2078_vm8, %v2072_v28  ;;  %2800 = vrcp.f32 %v4146_v6  ;;  %v1407_v36 = vor.u32 1.1754944e-38, %v1406_v13  ;;  %v1644_v15 = vand.u32 2147483647, %v4146_v6  ;;  %v1646_v35 = vand.u32 2147483648, %v4146_v6 }
 0x187   : > { %v2025_v45 = vpack.c.bf16 %v1961_v51, %v1961_v51  ;;  %v1399_v4 = vadd.f32 %v2789_v17, %v1398_v24  ;;  %2802 = vpow2.f32 %v2497_v56  ;;  %v2450_v9 = vmul.f32 -1.442695, %v4150_v50 }
 0x188   : > { %v2793_v7 = vpop.eup %2792  ;;  %v4167_v19 = vadd.f32 %v4110_v62, %v646_v34  ;;  %v4172_v1 = vadd.f32 %v4110_v62, %v686_v18  ;;  %vm1640_vm7 = vweird.f32 %v4146_v6  ;;  %vm4177_vm9 = vcmp.eq.f32.partialorder %v1644_v15, 8.507059e+37 }
 0x189   : > { %v2795_v5 = vpop.eup %2794  ;;  %2090 = vst.msk [vmem:[%s3231_s21 + $0x2c] sm:$0xf] %vm2078_vm8, %v2025_v45  ;;  %v1403_v16 = vsel %vm1402_vm5, %v2789_v17, %v1399_v4  ;;  %v4161_v41 = vadd.f32 1.0, %v2793_v7  ;;  %v4194_v13 = vadd.f32 %v4110_v62, %v726_v0 }
 0x18a   : > { %v2797_v25 = vpop.eup %2796  ;;  %v1408_v8 = vsel %vm1405_vm6, %v1407_v36, %v1403_v16  ;;  %v4164_v11 = vadd.f32 1.0, %v2795_v5  ;;  %v2466_v43 = vmul.f32 -1.442695, %v4167_v19  ;;  %v4191_v38 = vmul.f32 -1.442695, %v4172_v1 }
 0x18b   : > { %v2799_v29 = vpop.eup %2798  ;;  %v1977_v14 = vmul.f32 %v1408_v8, %v4001_v53  ;;  %2804 = vrcp.f32 %v4161_v41  ;;  %v1647_v53 = vor.u32 1.1754944e-38, %v1646_v35  ;;  %v1884_v57 = vand.u32 2147483647, %v4161_v41 }
 0x18c   : > { %v2801_v32 = vpop.eup %2800  ;;  %2806 = vrcp.f32 %v4164_v11  ;;  %v1886_v12 = vand.u32 2147483648, %v4161_v41  ;;  %v4183_v31 = vadd.f32 1.0, %v2797_v25  ;;  %v4188_v44 = vadd.f32 1.0, %v2799_v29 }
 0x18d   : > { %v2803_v33 = vpop.eup %2802  ;;  %v2041_v40 = vpack.c.bf16 %v1977_v14, %v1977_v14  ;;  %v1636_v54 = vmul.f32 %v2801_v32, %v4146_v6  ;;  %2808 = vpow2.f32 %v2450_v9  ;;  %vm1880_vm10 = vweird.f32 %v4161_v41 }
 0x18e   : > { %v1179_v10 = vand.u32 2147483647, %v4164_v11  ;;  %v1181_v42 = vand.u32 2147483648, %v4164_v11  ;;  %2810 = vrcp.f32 %v4183_v31  ;;  %v4200_v17 = vadd.f32 1.0, %v2803_v33 }
 0x18f   : > { %2106 = vst.msk [vmem:[%s3231_s21 + $0x6c] sm:$0xf] %vm2078_vm8, %v2041_v40  ;;  %v1637_v21 = vsub.f32 1.0, %v1636_v54  ;;  %vm1641_vm11 = vweird.f32 %v2801_v32  ;;  %vm1175_vm12 = vweird.f32 %v4164_v11  ;;  %2812 = vrcp.f32 %v4188_v44 }
 0x190   : > { %vm4205_vm13 = vcmp.eq.f32.partialorder %v1884_v57, 8.507059e+37  ;;  %v1887_v47 = vor.u32 1.1754944e-38, %v1886_v12  ;;  %2814 = vpow2.f32 %v2466_v43  ;;  %v1419_v37 = vand.u32 2147483647, %v4183_v31  ;;  %vm1642_vm14 = vmor %vm1640_vm7, %vm1641_vm11 }
 0x191   : > { %v2805_v26 = vpop.eup %2804  ;;  %v1638_v27 = vmul.f32 %v2801_v32, %v1637_v21  ;;  %v1421_v20 = vand.u32 2147483648, %v4183_v31  ;;  %vm4214_vm15 = vcmp.eq.f32.partialorder %v1179_v10, 8.507059e+37  ;;  %v1182_v56 = vor.u32 1.1754944e-38, %v1181_v42 }
 0x192   : > { %v2807_v49 = vpop.eup %2806  ;;  %v1876_v2 = vmul.f32 %v2805_v26, %v4161_v41  ;;  %2816 = vrcp.f32 %v4200_v17  ;;  %vm1881_vm0 = vweird.f32 %v2805_v26  ;;  %vm1415_vm1 = vweird.f32 %v4183_v31 }
 0x193   : > { %v2809_v59 = vpop.eup %2808  ;;  %v1639_v55 = vadd.f32 %v2801_v32, %v1638_v27  ;;  %v1171_v3 = vmul.f32 %v2807_v49, %v4164_v11  ;;  %vm1176_vm2 = vweird.f32 %v2807_v49  ;;  %vm1655_vm3 = vweird.f32 %v4188_v44  ;;  %vm1882_vm5 = vmor %vm1880_vm10, %vm1881_vm0 }
 0x194   : > { %v1877_v30 = vsub.f32 1.0, %v1876_v2  ;;  %v2811_v51 = vpop.eup %2810  ;;  %v1659_v6 = vand.u32 2147483647, %v4188_v44  ;;  %vm4226_vm4 = vcmp.eq.f32.partialorder %v1419_v37, 8.507059e+37  ;;  %v1422_v18 = vor.u32 1.1754944e-38, %v1421_v20  ;;  %vm1177_vm7 = vmor %vm1175_vm12, %vm1176_vm2 }
 0x195   : > { %v1643_v28 = vsel %vm1642_vm14, %v2801_v32, %v1639_v55  ;;  %v1172_v39 = vsub.f32 1.0, %v1171_v3  ;;  %v2813_v4 = vpop.eup %2812  ;;  %v1411_v36 = vmul.f32 %v2811_v51, %v4183_v31  ;;  %v1661_v9 = vand.u32 2147483648, %v4188_v44 }
 0x196   : > { %v1648_v24 = vsel %vm4177_vm9, %v1647_v53, %v1643_v28  ;;  %v1878_v45 = vmul.f32 %v2805_v26, %v1877_v30  ;;  %v2815_v5 = vpop.eup %2814  ;;  %v1651_v35 = vmul.f32 %v2813_v4, %v4188_v44  ;;  %v1899_v25 = vand.u32 2147483647, %v4200_v17  ;;  %v649_v30 = vpop.f32.mrf.mxu1 }
 0x197   : > { %v1993_v34 = vmul.f32 %v1648_v24, %v4016_v52  ;;  %v1173_v7 = vmul.f32 %v2807_v49, %v1172_v39  ;;  %v1412_v29 = vsub.f32 1.0, %v1411_v36  ;;  %vm1416_vm6 = vweird.f32 %v2811_v51 }
 0x198   : > { %v1879_v16 = vadd.f32 %v2805_v26, %v1878_v45  ;;  %v2817_v14 = vpop.eup %2816  ;;  %v1652_v0 = vsub.f32 1.0, %v1651_v35  ;;  %vm1656_vm9 = vweird.f32 %v2813_v4  ;;  %v4239_v33 = vadd.f32 1.0, %v2809_v59  ;;  %vm1417_vm10 = vmor %vm1415_vm1, %vm1416_vm6 }
 0x199   : > { %v2057_v8 = vpack.c.bf16 %v1993_v34, %v1993_v34  ;;  %v1174_v52 = vadd.f32 %v2807_v49, %v1173_v7  ;;  %v1413_v54 = vmul.f32 %v2811_v51, %v1412_v29  ;;  %v1891_v22 = vmul.f32 %v2817_v14, %v4200_v17  ;;  %vm1657_vm11 = vmor %vm1655_vm3, %vm1656_vm9  ;;  %v729_v7 = vpop.f32.mrf.mxu3 }
 0x19a   : > { %v1883_v32 = vsel %vm1882_vm5, %v2805_v26, %v1879_v16  ;;  %v1653_v11 = vmul.f32 %v2813_v4, %v1652_v0  ;;  %v4249_v12 = vadd.f32 1.0, %v2815_v5  ;;  %2818 = vrcp.f32 %v4239_v33 }
 0x19b   : > { %2122 = vst.msk [vmem:[%s3231_s21 + $0xac] sm:$0xf] %vm2078_vm8, %v2057_v8  ;;  %v1888_v40 = vsel %vm4205_vm13, %v1887_v47, %v1883_v32  ;;  %v1178_v41 = vsel %vm1177_vm7, %v2807_v49, %v1174_v52  ;;  %v1414_v21 = vadd.f32 %v2811_v51, %v1413_v54  ;;  %v1892_v10 = vsub.f32 1.0, %v1891_v22 }
 0x19c   : > { %v2009_v53 = vmul.f32 %v1888_v40, %v4113_v46  ;;  %v1183_v57 = vsel %vm4214_vm15, %v1182_v56, %v1178_v41  ;;  %v1654_v46 = vadd.f32 %v2813_v4, %v1653_v11  ;;  %v1662_v26 = vor.u32 1.1754944e-38, %v1661_v9 }
 0x19d   : > { %v1962_v43 = vmul.f32 %v1183_v57, %v4116_v61  ;;  %v1901_v27 = vand.u32 2147483648, %v4200_v17  ;;  %v1418_v2 = vsel %vm1417_vm10, %v2811_v51, %v1414_v21  ;;  %v1893_v61 = vmul.f32 %v2817_v14, %v1892_v10 }
 0x19e   : > { %v2073_v42 = vpack.c.bf16 %v2009_v53, %v2009_v53  ;;  %vm1896_vm12 = vweird.f32 %v2817_v14  ;;  %v1423_v31 = vsel %vm4226_vm4, %v1422_v18, %v1418_v2  ;;  %v1658_v47 = vsel %vm1657_vm11, %v2813_v4, %v1654_v46  ;;  %v651_v11 = vpop.f32.mrf.mxu1 }
 0x19f   : > { %v2026_v49 = vpack.c.bf16 %v1962_v43, %v1962_v43  ;;  %vm1660_vm13 = vcmp.eq.f32.partialorder %v1659_v6, 8.507059e+37  ;;  %2820 = vrcp.f32 %v4249_v12  ;;  %v1978_v59 = vmul.f32 %v1423_v31, %v4122_v60  ;;  %v691_v43 = vpop.f32.mrf.mxu2 }
 0x1a0   : > { %2138 = vst.msk [vmem:[%s3231_s21 + $0xec] sm:$0xf] %vm2078_vm8, %v2073_v42  ;;  %v1663_v55 = vsel %vm1660_vm13, %v1662_v26, %v1658_v47  ;;  %v1894_v3 = vadd.f32 %v2817_v14, %v1893_v61  ;;  %vm1895_vm14 = vweird.f32 %v4200_v17  ;;  %vm1900_vm0 = vcmp.eq.f32.partialorder %v1899_v25, 8.507059e+37  ;;  %v2819_v56 = vpop.eup %2818 }
 0x1a1   : > { %2091 = vst.msk [vmem:[%s3231_s21 + $0x30] sm:$0xf] %vm2078_vm8, %v2026_v49  ;;  %v1994_v44 = vmul.f32 %v1663_v55, %v4125_v58  ;;  %vm1897_vm15 = vmor %vm1895_vm14, %vm1896_vm12  ;;  %v1902_v37 = vor.u32 1.1754944e-38, %v1901_v27  ;;  %v1194_v20 = vand.u32 2147483647, %v4239_v33  ;;  %v2042_v28 = vpack.c.bf16 %v1978_v59, %v1978_v59 }
 0x1a2   : > { %v1898_v39 = vsel %vm1897_vm15, %v2817_v14, %v1894_v3  ;;  %2822 = vpow2.f32 %v4191_v38  ;;  %v2498_v60 = vmul.f32 -1.442695, %v4194_v13  ;;  %v1186_v24 = vmul.f32 %v2819_v56, %v4239_v33  ;;  %v611_v14 = vpop.f32.mrf.mxu0 }
 0x1a3   : > { %v2058_v51 = vpack.c.bf16 %v1994_v44, %v1994_v44  ;;  %v1903_v17 = vsel %vm1900_vm0, %v1902_v37, %v1898_v39  ;;  %2107 = vst.msk [vmem:[%s3231_s21 + $0x70] sm:$0xf] %vm2078_vm8, %v2042_v28  ;;  %vm1190_vm1 = vweird.f32 %v4239_v33  ;;  %v4281_v38 = vadd.f32 %v4110_v62, %v609_v48 }
 0x1a4   : > { %v2010_v58 = vmul.f32 %v1903_v17, %v4130_v23  ;;  %2824 = vpow2.f32 %v2498_v60  ;;  %v1187_v6 = vsub.f32 1.0, %v1186_v24  ;;  %v4284_v4 = vadd.f32 %v4110_v62, %v649_v30 }
 0x1a5   : > { %v2821_v45 = vpop.eup %2820  ;;  %2123 = vst.msk [vmem:[%s3231_s21 + $0xb0] sm:$0xf] %vm2078_vm8, %v2058_v51  ;;  %v4287_v34 = vadd.f32 %v4110_v62, %v689_v63  ;;  %vm4289_vm2 = vcmp.eq.f32.partialorder %v1194_v20, 8.507059e+37  ;;  %v1196_v15 = vand.u32 2147483648, %v4239_v33  ;;  %vm1191_vm3 = vweird.f32 %v2819_v56 }
 0x1a6   : > { %v2074_v36 = vpack.c.bf16 %v2010_v58, %v2010_v58  ;;  %v1426_v18 = vmul.f32 %v2821_v45, %v4249_v12  ;;  %v1188_v5 = vmul.f32 %v2819_v56, %v1187_v6  ;;  %v2451_v16 = vmul.f32 -1.442695, %v4281_v38  ;;  %vm1192_vm4 = vmor %vm1190_vm1, %vm1191_vm3 }
 0x1a7   : > { %v2467_v35 = vmul.f32 -1.442695, %v4284_v4  ;;  %v1434_v8 = vand.u32 2147483647, %v4249_v12  ;;  %v1436_v52 = vand.u32 2147483648, %v4249_v12  ;;  %v4302_v29 = vadd.f32 %v4110_v62, %v729_v7 }
 0x1a8   : > { %v2823_v9 = vpop.eup %2822  ;;  %2139 = vst.msk [vmem:[%s3231_s21 + $0xf0] sm:$0xf] %vm2078_vm8, %v2074_v36  ;;  %v1427_v25 = vsub.f32 1.0, %v1426_v18  ;;  %v1189_v32 = vadd.f32 %v2819_v56, %v1188_v5  ;;  %2826 = vpow2.f32 %v2451_v16  ;;  %v2483_v40 = vmul.f32 -1.442695, %v4287_v34 }
 0x1a9   : > { %v4304_v0 = vadd.f32 1.0, %v2823_v9  ;;  %v1197_v54 = vor.u32 1.1754944e-38, %v1196_v15  ;;  %vm1431_vm5 = vweird.f32 %v2821_v45  ;;  %2828 = vpow2.f32 %v2467_v35 }
 0x1aa   : > { %v2825_v41 = vpop.eup %2824  ;;  %v1428_v22 = vmul.f32 %v2821_v45, %v1427_v25  ;;  %v1193_v53 = vsel %vm1192_vm4, %v2819_v56, %v1189_v32  ;;  %vm1430_vm6 = vweird.f32 %v4249_v12  ;;  %v4313_v57 = vadd.f32 %v4110_v62, %v611_v14  ;;  %v731_v56 = vpop.f32.mrf.mxu3 }
 0x1ab   : > { %2830 = vrcp.f32 %v4304_v0  ;;  %v1198_v21 = vsel %vm4289_vm2, %v1197_v54, %v1193_v53  ;;  %v4317_v33 = vadd.f32 1.0, %v2825_v41  ;;  %v2499_v42 = vmul.f32 -1.442695, %v4302_v29  ;;  %vm1432_vm7 = vmor %vm1430_vm6, %vm1431_vm5 }
 0x1ac   : > { %v1429_v10 = vadd.f32 %v2821_v45, %v1428_v22  ;;  %v1963_v46 = vmul.f32 %v1198_v21, %v4150_v50  ;;  %vm1435_vm9 = vcmp.eq.f32.partialorder %v1434_v8, 8.507059e+37  ;;  %v1437_v12 = vor.u32 1.1754944e-38, %v1436_v52 }
 0x1ad   : > { %2832 = vpow2.f32 %v2483_v40  ;;  %v4323_v27 = vadd.f32 %v4110_v62, %v651_v11  ;;  %v4326_v49 = vadd.f32 %v4110_v62, %v691_v43  ;;  %v1674_v31 = vand.u32 2147483647, %v4304_v0 }
 0x1ae   : > { %v1433_v26 = vsel %vm1432_vm7, %v2821_v45, %v1429_v10  ;;  %2834 = vrcp.f32 %v4317_v33  ;;  %v2827_v2 = vpop.eup %2826  ;;  %v2027_v61 = vpack.c.bf16 %v1963_v46, %v1963_v46  ;;  %v2452_v50 = vmul.f32 -1.442695, %v4313_v57 }
 0x1af   : > { %v1438_v48 = vsel %vm1435_vm9, %v1437_v12, %v1433_v26  ;;  %v2829_v47 = vpop.eup %2828  ;;  %v1676_v55 = vand.u32 2147483648, %v4304_v0  ;;  %v4332_v3 = vadd.f32 1.0, %v2827_v2  ;;  %2836 = vpow2.f32 %v2499_v42 }
 0x1b0   : > { %v1979_v59 = vmul.f32 %v1438_v48, %v4167_v19  ;;  %2092 = vst.msk [vmem:[%s3231_s21 + $0x34] sm:$0xf] %vm2078_vm8, %v2027_v61  ;;  %v1914_v37 = vand.u32 2147483647, %v4317_v33  ;;  %v4337_v20 = vadd.f32 1.0, %v2829_v47  ;;  %vm1670_vm10 = vweird.f32 %v4304_v0 }
 0x1b1   : > { %v2831_v44 = vpop.eup %2830  ;;  %2838 = vrcp.f32 %v4332_v3  ;;  %v2468_v19 = vmul.f32 -1.442695, %v4323_v27  ;;  %vm4343_vm11 = vcmp.eq.f32.partialorder %v1674_v31, 8.507059e+37  ;;  %v1916_v60 = vand.u32 2147483648, %v4317_v33 }
 0x1b2   : > { %v2043_v30 = vpack.c.bf16 %v1979_v59, %v1979_v59  ;;  %v1666_v63 = vmul.f32 %v2831_v44, %v4304_v0  ;;  %2840 = vrcp.f32 %v4337_v20  ;;  %v1677_v24 = vor.u32 1.1754944e-38, %v1676_v55 }
 0x1b3   : > { %v2833_v28 = vpop.eup %2832  ;;  %vm1910_vm12 = vweird.f32 %v4317_v33  ;;  %v4353_v58 = vmul.f32 -1.442695, %v4326_v49  ;;  %vm4356_vm13 = vcmp.eq.f32.partialorder %v1914_v37, 8.507059e+37  ;;  %2842 = vpow2.f32 %v2452_v50 }
 0x1b4   : > { %v2835_v51 = vpop.eup %2834  ;;  %2108 = vst.msk [vmem:[%s3231_s21 + $0x74] sm:$0xf] %vm2078_vm8, %v2043_v30  ;;  %v1667_v17 = vsub.f32 1.0, %v1666_v63  ;;  %v4361_v7 = vadd.f32 %v4110_v62, %v731_v56  ;;  %vm1671_vm14 = vweird.f32 %v2831_v44  ;;  %v1209_v15 = vand.u32 2147483647, %v4332_v3 }
 0x1b5   : > { %v1906_v45 = vmul.f32 %v2835_v51, %v4317_v33  ;;  %v2837_v36 = vpop.eup %2836  ;;  %v4364_v18 = vadd.f32 1.0, %v2833_v28  ;;  %v1917_v16 = vor.u32 1.1754944e-38, %v1916_v60  ;;  %vm1205_vm15 = vweird.f32 %v4332_v3  ;;  %vm1672_vm1 = vmor %vm1670_vm10, %vm1671_vm14 }
 0x1b6   : > { %v1668_v23 = vmul.f32 %v2831_v44, %v1667_v17  ;;  %v1211_v35 = vand.u32 2147483648, %v4332_v3  ;;  %vm1445_vm0 = vweird.f32 %v4337_v20  ;;  %v4370_v62 = vadd.f32 1.0, %v2837_v36 }
 0x1b7   : > { %v1907_v5 = vsub.f32 1.0, %v1906_v45  ;;  %v2839_v9 = vpop.eup %2838  ;;  %2844 = vrcp.f32 %v4364_v18  ;;  %vm1911_vm2 = vweird.f32 %v2835_v51  ;;  %v1449_v32 = vand.u32 2147483647, %v4337_v20 }
 0x1b8   : > { %v1669_v25 = vadd.f32 %v2831_v44, %v1668_v23  ;;  %v2841_v8 = vpop.eup %2840  ;;  %v1201_v14 = vmul.f32 %v2839_v9, %v4332_v3  ;;  %vm4376_vm3 = vcmp.eq.f32.partialorder %v1209_v15, 8.507059e+37  ;;  %v1451_v22 = vand.u32 2147483648, %v4337_v20  ;;  %vm1912_vm4 = vmor %vm1910_vm12, %vm1911_vm2 }
 0x1b9   : > { %v1908_v52 = vmul.f32 %v2835_v51, %v1907_v5  ;;  %v1441_v54 = vmul.f32 %v2841_v8, %v4337_v20  ;;  %v2843_v53 = vpop.eup %2842  ;;  %2846 = vpow2.f32 %v2468_v19  ;;  %v1212_v10 = vor.u32 1.1754944e-38, %v1211_v35 }
 0x1ba   : > { %v1673_v40 = vsel %vm1672_vm1, %v2831_v44, %v1669_v25  ;;  %v1202_v43 = vsub.f32 1.0, %v1201_v14  ;;  %2848 = vrcp.f32 %v4370_v62  ;;  %vm1206_vm5 = vweird.f32 %v2839_v9 }
 0x1bb   : > { %v1678_v0 = vsel %vm4343_vm11, %v1677_v24, %v1673_v40  ;;  %v1909_v11 = vadd.f32 %v2835_v51, %v1908_v52  ;;  %v1442_v42 = vsub.f32 1.0, %v1441_v54  ;;  %vm1446_vm6 = vweird.f32 %v2841_v8  ;;  %vm1207_vm9 = vmor %vm1205_vm15, %vm1206_vm5 }
 0x1bc   : > { %v1995_v21 = vmul.f32 %v1678_v0, %v4172_v1  ;;  %v1203_v12 = vmul.f32 %v2839_v9, %v1202_v43  ;;  %v4390_v31 = vadd.f32 1.0, %v2843_v53  ;;  %vm4393_vm7 = vcmp.eq.f32.partialorder %v1449_v32, 8.507059e+37  ;;  %vm1447_vm10 = vmor %vm1445_vm0, %vm1446_vm6 }
 0x1bd   : > { %v1913_v46 = vsel %vm1912_vm4, %v2835_v51, %v1909_v11  ;;  %v2845_v26 = vpop.eup %2844  ;;  %v1443_v48 = vmul.f32 %v2841_v8, %v1442_v42  ;;  %v1452_v55 = vor.u32 1.1754944e-38, %v1451_v22  ;;  %v1689_v44 = vand.u32 2147483647, %v4364_v18 }
 0x1be   : > { %v2059_v2 = vpack.c.bf16 %v1995_v21, %v1995_v21  ;;  %v1918_v61 = vsel %vm4356_vm13, %v1917_v16, %v1913_v46  ;;  %v1204_v33 = vadd.f32 %v2839_v9, %v1203_v12  ;;  %v1681_v47 = vmul.f32 %v2845_v26, %v4364_v18 }
 0x1bf   : > { %v2011_v1 = vmul.f32 %v1918_v61, %v4194_v13  ;;  %v1444_v59 = vadd.f32 %v2841_v8, %v1443_v48  ;;  %2850 = vrcp.f32 %v4390_v31  ;;  %v2847_v13 = vpop.eup %2846  ;;  %v2500_v19 = vmul.f32 -1.442695, %v4361_v7 }
 0x1c0   : > { %2124 = vst.msk [vmem:[%s3231_s21 + $0xb4] sm:$0xf] %vm2078_vm8, %v2059_v2  ;;  %v1208_v30 = vsel %vm1207_vm9, %v2839_v9, %v1204_v33  ;;  %v1682_v63 = vsub.f32 1.0, %v1681_v47  ;;  %v2849_v56 = vpop.eup %2848  ;;  %vm1686_vm11 = vweird.f32 %v2845_v26  ;;  %v1691_v39 = vand.u32 2147483648, %v4364_v18 }
 0x1c1   : > { %v2075_v37 = vpack.c.bf16 %v2011_v1, %v2011_v1  ;;  %v1213_v3 = vsel %vm4376_vm3, %v1212_v10, %v1208_v30  ;;  %v1448_v28 = vsel %vm1447_vm10, %v2841_v8, %v1444_v59  ;;  %v1921_v17 = vmul.f32 %v2849_v56, %v4370_v62 }
 0x1c2   : > { %v1964_v60 = vmul.f32 %v1213_v3, %v4281_v38  ;;  %v1453_v51 = vsel %vm4393_vm7, %v1452_v55, %v1448_v28  ;;  %v1683_v20 = vmul.f32 %v2845_v26, %v1682_v63  ;;  %vm1685_vm12 = vweird.f32 %v4364_v18 }
 0x1c3   : > { %2140 = vst.msk [vmem:[%s3231_s21 + $0xf4] sm:$0xf] %vm2078_vm8, %v2075_v37  ;;  %v1980_v24 = vmul.f32 %v1453_v51, %v4284_v4  ;;  %vm4419_vm13 = vcmp.eq.f32.partialorder %v1689_v44, 8.507059e+37  ;;  %v1929_v6 = vand.u32 2147483647, %v4370_v62  ;;  %v1922_v23 = vsub.f32 1.0, %v1921_v17  ;;  %vm1687_vm14 = vmor %vm1685_vm12, %vm1686_vm11 }
 0x1c4   : > { %v2028_v36 = vpack.c.bf16 %v1964_v60, %v1964_v60  ;;  %v1684_v38 = vadd.f32 %v2845_v26, %v1683_v20  ;;  %v4424_v15 = vadd.f32 1.0, %v2847_v13  ;;  %v1692_v35 = vor.u32 1.1754944e-38, %v1691_v39 }
 0x1c5   : > { %v2851_v5 = vpop.eup %2850  ;;  %v2044_v16 = vpack.c.bf16 %v1980_v24, %v1980_v24  ;;  %v1931_v4 = vand.u32 2147483648, %v4370_v62  ;;  %2852 = vpow2.f32 %v4353_v58  ;;  %v1923_v9 = vmul.f32 %v2849_v56, %v1922_v23 }
 0x1c6   : > { %2093 = vst.msk [vmem:[%s3231_s21 + $0x38] sm:$0xf] %vm2078_vm8, %v2028_v36  ;;  %v1688_v18 = vsel %vm1687_vm14, %v2845_v26, %v1684_v38  ;;  %vm1926_vm15 = vweird.f32 %v2849_v56  ;;  %v1216_v25 = vmul.f32 %v2851_v5, %v4390_v31  ;;  %vm1925_vm0 = vweird.f32 %v4370_v62 }
 0x1c7   : > { %2109 = vst.msk [vmem:[%s3231_s21 + $0x78] sm:$0xf] %vm2078_vm8, %v2044_v16  ;;  %v1693_v8 = vsel %vm4419_vm13, %v1692_v35, %v1688_v18  ;;  %2854 = vrcp.f32 %v4424_v15  ;;  %v1924_v58 = vadd.f32 %v2849_v56, %v1923_v9  ;;  %vm1930_vm1 = vcmp.eq.f32.partialorder %v1929_v6, 8.507059e+37  ;;  %vm1927_vm2 = vmor %vm1925_vm0, %vm1926_vm15 }
 0x1c8   : > { %v1996_v52 = vmul.f32 %v1693_v8, %v4287_v34  ;;  %v1217_v14 = vsub.f32 1.0, %v1216_v25  ;;  %v1932_v32 = vor.u32 1.1754944e-38, %v1931_v4  ;;  %v1224_v40 = vand.u32 2147483647, %v4390_v31 }
 0x1c9   : > { %v1226_v41 = vand.u32 2147483648, %v4390_v31  ;;  %2856 = vpow2.f32 %v2500_v19  ;;  %v1928_v22 = vsel %vm1927_vm2, %v2849_v56, %v1924_v58  ;;  %vm1221_vm3 = vweird.f32 %v2851_v5 }
 0x1ca   : > { %v2060_v54 = vpack.c.bf16 %v1996_v52, %v1996_v52  ;;  %v1218_v53 = vmul.f32 %v2851_v5, %v1217_v14  ;;  %v1933_v0 = vsel %vm1930_vm1, %v1932_v32, %v1928_v22  ;;  %vm1220_vm4 = vweird.f32 %v4390_v31 }
 0x1cb   : > { %v2853_v62 = vpop.eup %2852  ;;  %v2012_v34 = vmul.f32 %v1933_v0, %v4302_v29  ;;  %vm1222_vm5 = vmor %vm1220_vm4, %vm1221_vm3  ;;  %v1227_v10 = vor.u32 1.1754944e-38, %v1226_v41  ;;  %vm1225_vm6 = vcmp.eq.f32.partialorder %v1224_v40, 8.507059e+37  ;;  %v1464_v31 = vand.u32 2147483647, %v4424_v15 }
 0x1cc   : > { %2125 = vst.msk [vmem:[%s3231_s21 + $0xb8] sm:$0xf] %vm2078_vm8, %v2060_v54  ;;  %v1219_v11 = vadd.f32 %v2851_v5, %v1218_v53  ;;  %v973_v43 = vadd.f32 1.0, %v2853_v62  ;;  %v1466_v1 = vand.u32 2147483648, %v4424_v15  ;;  %vm1460_vm9 = vweird.f32 %v4424_v15 }
 0x1cd   : > { %v2855_v21 = vpop.eup %2854  ;;  %v2076_v42 = vpack.c.bf16 %v2012_v34, %v2012_v34  ;;  %vm1465_vm11 = vcmp.eq.f32.partialorder %v1464_v31, 8.507059e+37 }
 0x1ce   : > { %v1223_v46 = vsel %vm1222_vm5, %v2851_v5, %v1219_v11  ;;  %v1456_v12 = vmul.f32 %v2855_v21, %v4424_v15  ;;  %2858 = vrcp.f32 %v973_v43  ;;  %vm1461_vm7 = vweird.f32 %v2855_v21 }
 0x1cf   : > { %v2857_v26 = vpop.eup %2856  ;;  %v1228_v2 = vsel %vm1225_vm6, %v1227_v10, %v1223_v46  ;;  %2141 = vst.msk [vmem:[%s3231_s21 + $0xf8] sm:$0xf] %vm2078_vm8, %v2076_v42  ;;  %vm1462_vm10 = vmor %vm1460_vm9, %vm1461_vm7  ;;  %v1467_v55 = vor.u32 1.1754944e-38, %v1466_v1  ;;  %v1706_v19 = vand.u32 2147483648, %v973_v43  ;;  %v1704_v39 = vand.u32 2147483647, %v973_v43 }
 0x1d0   : > { %v1965_v29 = vmul.f32 %v1228_v2, %v4313_v57  ;;  %v1457_v61 = vsub.f32 1.0, %v1456_v12  ;;  %v989_v48 = vadd.f32 1.0, %v2857_v26  ;;  %vm1700_vm13 = vweird.f32 %v973_v43 }
 0x1d1   : > { %v1707_v17 = vor.u32 1.1754944e-38, %v1706_v19  ;;  %vm1705_vm0 = vcmp.eq.f32.partialorder %v1704_v39, 8.507059e+37 }
 0x1d2   : > { %v2029_v33 = vpack.c.bf16 %v1965_v29, %v1965_v29  ;;  %v1458_v50 = vmul.f32 %v2855_v21, %v1457_v61  ;;  %2860 = vrcp.f32 %v989_v48  ;;  %v1946_v20 = vand.u32 2147483648, %v989_v48 }
 0x1d3   : > { %vm1940_vm1 = vweird.f32 %v989_v48 }
 0x1d4   : > { %2094 = vst.msk [vmem:[%s3231_s21 + $0x3c] sm:$0xf] %vm2078_vm8, %v2029_v33  ;;  %v1459_v47 = vadd.f32 %v2855_v21, %v1458_v50  ;;  %v2859_v59 = vpop.eup %2858  ;;  %v1947_v23 = vor.u32 1.1754944e-38, %v1946_v20 }
 0x1d5   : > { %v1696_v44 = vmul.f32 %v2859_v59, %v973_v43  ;;  %vm1701_vm12 = vweird.f32 %v2859_v59 }
 0x1d6   : > { %v1463_v57 = vsel %vm1462_vm10, %v2855_v21, %v1459_v47  ;;  %vm1702_vm14 = vmor %vm1700_vm13, %vm1701_vm12 }
 0x1d7   : > { %v1468_v13 = vsel %vm1465_vm11, %v1467_v55, %v1463_v57  ;;  %v1697_v63 = vsub.f32 1.0, %v1696_v44 }
 0x1d8   : > { %v2861_v37 = vpop.eup %2860  ;;  %v1981_v30 = vmul.f32 %v1468_v13, %v4323_v27  ;;  %v1944_v27 = vand.u32 2147483647, %v989_v48 }
 0x1d9   : > { %v1936_v56 = vmul.f32 %v2861_v37, %v989_v48  ;;  %v1698_v28 = vmul.f32 %v2859_v59, %v1697_v63  ;;  %vm1941_vm15 = vweird.f32 %v2861_v37 }
 0x1da   : > { %v2045_v3 = vpack.c.bf16 %v1981_v30, %v1981_v30  ;;  %vm1942_vm2 = vmor %vm1940_vm1, %vm1941_vm15  ;;  %vm1945_vm3 = vcmp.eq.f32.partialorder %v1944_v27, 8.507059e+37 }
 0x1db   : > { %v1937_v60 = vsub.f32 1.0, %v1936_v56  ;;  %v1699_v51 = vadd.f32 %v2859_v59, %v1698_v28 }
 0x1dc   : > { %2110 = vst.msk [vmem:[%s3231_s21 + $0x7c] sm:$0xf] %vm2078_vm8, %v2045_v3 }
 0x1dd   : > { %v1938_v24 = vmul.f32 %v2861_v37, %v1937_v60  ;;  %v1703_v45 = vsel %vm1702_vm14, %v2859_v59, %v1699_v51 }
 0x1de   : > { %v1708_v6 = vsel %vm1705_vm0, %v1707_v17, %v1703_v45 }
 0x1df   : > { %v1939_v36 = vadd.f32 %v2861_v37, %v1938_v24  ;;  %v1997_v38 = vmul.f32 %v1708_v6, %v4326_v49 }
 0x1e1   : > { %v1943_v15 = vsel %vm1942_vm2, %v2861_v37, %v1939_v36  ;;  %v2061_v5 = vpack.c.bf16 %v1997_v38, %v1997_v38 }
 0x1e2   : > { %v1948_v16 = vsel %vm1945_vm3, %v1947_v23, %v1943_v15 }
 0x1e3   : > { %v2013_v35 = vmul.f32 %v1948_v16, %v4361_v7  ;;  %2126 = vst.msk [vmem:[%s3231_s21 + $0xbc] sm:$0xf] %vm2078_vm8, %v2061_v5 }
 0x1e5   : > { %v2077_v4 = vpack.c.bf16 %v2013_v35, %v2013_v35 }
 0x1e7   : > { %2142 = vst.msk [vmem:[%s3231_s21 + $0xfc] sm:$0xf] %vm2078_vm8, %v2077_v4 }
 0x1e8   : > { %2891 = shalt.err (!%p2888_p5)
}
 0x1e9   : > { %s2945_s18 = smov 64   ;;  %s2946_s21 = smov 4  }
 0x1ea   : > { %2547 = dma.vmem_to_hbm [thread:$0]  (%p3007_p4), %s2158_s15, 4096, %s2160_s6, %s2144_s7, %s2945_s18, %s2945_s18, %s2946_s21  }
 0x1eb PF: > { %p2553_p6 = scmp.ge.s32.totalorder %s2942_s17, 2  ;;  %s2174_s27 = sand.u32 1, %s2922_s12  }
 0x1ec   : > { %s2175_s28 = scalar_lea.sflag [#allocation3], %s2174_s27 }
 0x1ed   : > { %p2550_p7 = pnand %p2553_p6, %p3014_p8 }
 0x1ef   : > { %p2551_p9 = pneg %p2550_p7 }
 0x1f1   : > { %2917 = dma.done.wait (%p2551_p9), %s2175_s28, 4096  }
 0x1f2   : > { %2919 = vsyncadd (%p2551_p9), %s2175_s28, 4294963200  ;;  %s16_s17 = sadd.s32 1, %s2942_s17   ;;  %s4606_s12 = smov %s2926_s13 }
 0x1f3   : > { %p13_p10 = scmp.ge.s32.totalorder %s16_s17, 6   ;;  %s4607_s13 = smov %s2930_s14 }
 0x1f4   : > { %s4608_s14 = smov %s3020_s25  ;;  %s4609_s15 = smov %s2938_s16 }
 0x1f5   : > { %s4610_s16 = smov %s4612_s20  ;;  %15 = sbr.rel (!%p13_p10) target bundleno = 4 (0x4), region = 73 }
 0x1fa   :  { %2181 = vsyncpa [#allocation3], 1 }
 0x1fb   :  { %2183 = vsyncpa [#allocation3 + $0x1], 1 }

</bundles_post_ra>
